<compile_context>
chip_gen: v5e
topology: v5e:2x2
jax: 0.10.0
libtpu: 0.0.40
codegen_flags: <defaults>
</compile_context>

<pallas_src>
import functools

import jax
import jax.numpy as jnp
from jax.experimental import pallas as pl
from jax.experimental.pallas import tpu as pltpu

EPS = 1e-5


# ---------------------------------------------------------------------------
# shared residual + LayerNorm epilogue (f32, one-pass moments)
# ---------------------------------------------------------------------------
def _residual_layernorm(y, alpha, gamma):
    """alpha * (y - mean) / (std + eps) + gamma ; unbiased std (torch default)."""
    h = y.shape[-1]
    s1 = jnp.sum(y, axis=-1, keepdims=True)
    s2 = jnp.sum(y * y, axis=-1, keepdims=True)
    mean = s1 * (1.0 / h)
    var = jnp.maximum(s2 - s1 * mean, 0.0) * (1.0 / (h - 1))
    std = jnp.sqrt(var)
    # One reciprocal per row, alpha folded into the scale -> FMA-shaped epilogue.
    scale = alpha * pl.reciprocal(std + EPS, approx=False)
    return (y - mean) * scale + gamma


# ---------------------------------------------------------------------------
# head-batched attention core (softmax scale already folded into wq/bq)
# ---------------------------------------------------------------------------
def _attention_core(q, k, v, wo_ref, bo_ref, *, num_heads, compute_dtype):
    sq, hdim = q.shape
    d_k = hdim // num_heads

    # Build head-major (nh, S, d_k) operands once (leading-axis stack of lane
    # slices), then issue single batched MXU contractions instead of a per-head
    # matmul loop + lane concat.
    def to_heads(t):
        return jnp.stack(
            [t[:, i * d_k:(i + 1) * d_k] for i in range(num_heads)], axis=0
        ).astype(compute_dtype)

    qh, kh, vh = to_heads(q), to_heads(k), to_heads(v)        # (nh, S, d_k)

    s = jax.lax.dot_general(                                   # (nh, Sq, Skv)
        qh, kh, (((2,), (2,)), ((0,), (0,))),
        preferred_element_type=jnp.float32)
    # TODO(synk): mask path (masked_fill(mask == 0, 1e-8)) not implemented.
    s = s - jnp.max(s, axis=-1, keepdims=True)
    e = jnp.exp(s)
    p = e * pl.reciprocal(jnp.sum(e, axis=-1, keepdims=True), approx=True)

    ctx = jax.lax.dot_general(                                 # (nh, Sq, d_k)
        p.astype(compute_dtype), vh, (((2,), (1,)), ((0,), (0,))),
        preferred_element_type=jnp.float32)
    ctx = jnp.concatenate([ctx[i] for i in range(num_heads)], axis=-1)  # (Sq,H)

    return (jnp.dot(ctx.astype(wo_ref.dtype), wo_ref[...],
                    preferred_element_type=jnp.float32) + bo_ref[...])


# ---------------------------------------------------------------------------
# fused DecoderLayer kernel: self-attn -> cross-attn -> FFN (grid over batch)
# ---------------------------------------------------------------------------
def decoder_layer_kernel(ln_ref, x_ref, enc_ref,
                         wqkv_s_ref, bqkv_s_ref, wo_s_ref, bo_s_ref,
                         wq_c_ref, bq_c_ref, wkv_c_ref, bkv_c_ref,
                         wo_c_ref, bo_c_ref,
                         w1_ref, b1_ref, w2_ref, b2_ref,
                         o_ref, *, num_heads):
    x = x_ref[0]                       # (Sq, H), native dtype
    enc = enc_ref[0]                   # (Ssrc, H)
    hdim = x.shape[-1]
    cdt = x.dtype

    # ---- self-attention sublayer: fused (H, 3H) QKV projection ----
    qkv = (jnp.dot(x, wqkv_s_ref[...], preferred_element_type=jnp.float32)
           + bqkv_s_ref[...])
    attn = _attention_core(qkv[:, :hdim], qkv[:, hdim:2 * hdim],
                           qkv[:, 2 * hdim:], wo_s_ref, bo_s_ref,
                           num_heads=num_heads, compute_dtype=cdt)
    x1 = _residual_layernorm(x.astype(jnp.float32) + attn, ln_ref[0], ln_ref[1])

    # ---- cross-attention sublayer: fused (H, 2H) K|V projection of enc ----
    q = (jnp.dot(x1.astype(cdt), wq_c_ref[...],
                 preferred_element_type=jnp.float32) + bq_c_ref[...])
    kvp = (jnp.dot(enc, wkv_c_ref[...], preferred_element_type=jnp.float32)
           + bkv_c_ref[...])
    attn = _attention_core(q, kvp[:, :hdim], kvp[:, hdim:], wo_c_ref, bo_c_ref,
                           num_heads=num_heads, compute_dtype=cdt)
    x2 = _residual_layernorm(x1 + attn, ln_ref[2], ln_ref[3])

    # ---- feed-forward sublayer ----
    h1 = (jnp.dot(x2.astype(cdt), w1_ref[...],
                  preferred_element_type=jnp.float32) + b1_ref[...])
    h1 = jnp.maximum(h1, 0.0)                      # relu (dropout = identity)
    ffo = (jnp.dot(h1.astype(w2_ref.dtype), w2_ref[...],
                   preferred_element_type=jnp.float32) + b2_ref[...])
    x3 = _residual_layernorm(x2 + ffo, ln_ref[4], ln_ref[5])

    o_ref[0] = x3.astype(o_ref.dtype)


# ---------------------------------------------------------------------------
# DecoderLayer.forward
# ---------------------------------------------------------------------------
def decoder_layer_forward(x, enc_out, self_attn, cross_attn, ff, ln_params,
                          *, num_heads):
    """x: (B, Sq, H) target, enc_out: (B, Ssrc, H) encoder output."""
    B, Sq, H = x.shape
    Ssrc = enc_out.shape[1]
    I = ff["w1"].shape[1]
    d_k = H // num_heads
    scale = 1.0 / (float(d_k) ** 0.5)

    # Fold the softmax 1/sqrt(d_k) scale into the query projection and fuse
    # the projection weights: wq|wk|wv -> (H, 3H) for self-attn, wk|wv -> (H, 2H)
    # for cross-attn (slices in-kernel land on 128-aligned lane boundaries).
    wqkv_s = jnp.concatenate(
        [self_attn["wq"] * scale, self_attn["wk"], self_attn["wv"]], axis=1)
    bqkv_s = jnp.concatenate(
        [self_attn["bq"] * scale, self_attn["bk"], self_attn["bv"]], axis=1)
    wq_c = cross_attn["wq"] * scale
    bq_c = cross_attn["bq"] * scale
    wkv_c = jnp.concatenate([cross_attn["wk"], cross_attn["wv"]], axis=1)
    bkv_c = jnp.concatenate([cross_attn["bk"], cross_attn["bv"]], axis=1)

    (a0, g0), (a1, g1), (a2, g2) = ln_params
    ln_scalars = jnp.concatenate([a0, g0, a1, g1, a2, g2]).astype(jnp.float32)

    weights = (wqkv_s, bqkv_s, self_attn["wo"], self_attn["bo"],
               wq_c, bq_c, wkv_c, bkv_c, cross_attn["wo"], cross_attn["bo"],
               ff["w1"], ff["b1"], ff["w2"], ff["b2"])

    # Explicit VMEM budget from actual block footprints (x2 for double-buffered
    # activation tiles); never below the 32 MiB default scoped limit.
    weight_bytes = sum(int(w.size) * w.dtype.itemsize for w in weights)
    act_bytes = (Sq * H + Ssrc * H + Sq * H) * x.dtype.itemsize
    vmem_limit = int(min(128 * 2 ** 20,
                         max(32 * 2 ** 20,
                             2 * (weight_bytes + act_bytes) + (8 << 20))))

    def const(shape):
        return pl.BlockSpec(shape, lambda b: (0,) * len(shape))

    return pl.pallas_call(
        functools.partial(decoder_layer_kernel, num_heads=num_heads),
        out_shape=jax.ShapeDtypeStruct((B, Sq, H), x.dtype),
        grid_spec=pltpu.PrefetchScalarGridSpec(
            num_scalar_prefetch=0,
            grid=(B,),
            in_specs=[
                pl.BlockSpec(memory_space=pltpu.SMEM),            # LN scalars (6,)
                pl.BlockSpec((1, Sq, H), lambda b: (b, 0, 0)),    # x
                pl.BlockSpec((1, Ssrc, H), lambda b: (b, 0, 0)),  # enc_out
                const((H, 3 * H)), const((1, 3 * H)),             # self: wqkv, bqkv
                const((H, H)), const((1, H)),                     # self: wo, bo
                const((H, H)), const((1, H)),                     # cross: wq, bq
                const((H, 2 * H)), const((1, 2 * H)),             # cross: wkv, bkv
                const((H, H)), const((1, H)),                     # cross: wo, bo
                const((H, I)), const((1, I)),                     # ffn: w1, b1
                const((I, H)), const((1, H)),                     # ffn: w2, b2
            ],
            out_specs=pl.BlockSpec((1, Sq, H), lambda b: (b, 0, 0)),
        ),
        compiler_params=pltpu.CompilerParams(
            dimension_semantics=("parallel",),
            vmem_limit_bytes=vmem_limit),
    )(ln_scalars, x, enc_out, *weights)


# ---------------------------------------------------------------------------
# Pure-JAX reference (mirrors the PyTorch module)
# ---------------------------------------------------------------------------
def decoder_layer_reference(x, enc_out, self_attn, cross_attn, ff, ln_params,
                            *, num_heads):
    def ln(y, a, g):
        mean = y.mean(-1, keepdims=True)
        std = jnp.std(y, axis=-1, ddof=1, keepdims=True)
        return a[0] * (y - mean) / (std + EPS) + g[0]

    def mha(q_in, kv_in, p):
        B, Sq, H = q_in.shape
        Skv = kv_in.shape[1]
        dk = H // num_heads
        q = q_in @ p["wq"] + p["bq"][0]
        k = kv_in @ p["wk"] + p["bk"][0]
        v = kv_in @ p["wv"] + p["bv"][0]
        q = q.reshape(B, Sq, num_heads, dk).transpose(0, 2, 1, 3)
        k = k.reshape(B, Skv, num_heads, dk).transpose(0, 2, 1, 3)
        v = v.reshape(B, Skv, num_heads, dk).transpose(0, 2, 1, 3)
        s = jnp.einsum("bhqd,bhkd->bhqk", q, k) / jnp.sqrt(jnp.float32(dk))
        a = jax.nn.softmax(s, axis=-1)
        ctx = jnp.einsum("bhqk,bhkd->bhqd", a, v)
        ctx = ctx.transpose(0, 2, 1, 3).reshape(B, Sq, H)
        return ctx @ p["wo"] + p["bo"][0]

    def ffn(y, p):
        hmid = jnp.maximum(y @ p["w1"] + p["b1"][0], 0.0)
        return hmid @ p["w2"] + p["b2"][0]

    (a0, g0), (a1, g1), (a2, g2) = ln_params
    x1 = ln(x + mha(x, x, self_attn), a0, g0)
    x2 = ln(x1 + mha(x1, enc_out, cross_attn), a1, g1)
    x3 = ln(x2 + ffn(x2, ff), a2, g2)
    return x3


if __name__ == "__main__":
    key = jax.random.PRNGKey(0)
    ks = jax.random.split(key, 24)

    B, S_TGT, S_SRC = 2, 8, 8
    H, NUM_HEADS, FF_DIM = 128, 4, 256      # lane-dense H (multiple of 128)

    def wgen(k, shape, scale=0.05):
        return (scale * jax.random.normal(k, shape)).astype(jnp.float32)

    x = jax.random.normal(ks[0], (B, S_TGT, H), dtype=jnp.float32)
    enc_out = jax.random.normal(ks[1], (B, S_SRC, H), dtype=jnp.float32)

    self_attn = dict(
        wq=wgen(ks[2], (H, H)), bq=wgen(ks[3], (1, H)),
        wk=wgen(ks[4], (H, H)), bk=wgen(ks[5], (1, H)),
        wv=wgen(ks[6], (H, H)), bv=wgen(ks[7], (1, H)),
        wo=wgen(ks[8], (H, H)), bo=wgen(ks[9], (1, H)),
    )
    cross_attn = dict(
        wq=wgen(ks[10], (H, H)), bq=wgen(ks[11], (1, H)),
        wk=wgen(ks[12], (H, H)), bk=wgen(ks[13], (1, H)),
        wv=wgen(ks[14], (H, H)), bv=wgen(ks[15], (1, H)),
        wo=wgen(ks[16], (H, H)), bo=wgen(ks[17], (1, H)),
    )
    ff = dict(
        w1=wgen(ks[18], (H, FF_DIM)), b1=wgen(ks[19], (1, FF_DIM)),
        w2=wgen(ks[20], (FF_DIM, H)), b2=wgen(ks[21], (1, H)),
    )
    # Layernormalization init is alpha=1, gamma=0; perturb to exercise the path.
    ln_params = [
        (jnp.array([1.0 + 0.1 * i], dtype=jnp.float32),
         jnp.array([0.05 * i], dtype=jnp.float32))
        for i in range(3)
    ]

    out = decoder_layer_forward(x, enc_out, self_attn, cross_attn, ff,
                                ln_params, num_heads=NUM_HEADS)
    out = jax.block_until_ready(out)

    ref = decoder_layer_reference(x, enc_out, self_attn, cross_attn, ff,
                                  ln_params, num_heads=NUM_HEADS)
    assert out.shape == (B, S_TGT, H), out.shape
    max_err = float(jnp.max(jnp.abs(out - ref)))
    assert jnp.allclose(out, ref, atol=5e-3, rtol=5e-3), max_err
    print("KERNEL_OK")
</pallas_src>

<mosaic_0001>
module attributes {stable_mosaic.version = 11 : i64} {
  func.func @decoder_layer_kernel(%arg0: i32, %arg1: memref<6xf32, #tpu.memory_space<smem>>, %arg2: memref<1x8x128xf32, #tpu.memory_space<vmem>>, %arg3: memref<1x8x128xf32, #tpu.memory_space<vmem>>, %arg4: memref<128x384xf32, #tpu.memory_space<vmem>>, %arg5: memref<1x384xf32, #tpu.memory_space<vmem>>, %arg6: memref<128x128xf32, #tpu.memory_space<vmem>>, %arg7: memref<1x128xf32, #tpu.memory_space<vmem>>, %arg8: memref<128x128xf32, #tpu.memory_space<vmem>>, %arg9: memref<1x128xf32, #tpu.memory_space<vmem>>, %arg10: memref<128x256xf32, #tpu.memory_space<vmem>>, %arg11: memref<1x256xf32, #tpu.memory_space<vmem>>, %arg12: memref<128x128xf32, #tpu.memory_space<vmem>>, %arg13: memref<1x128xf32, #tpu.memory_space<vmem>>, %arg14: memref<128x256xf32, #tpu.memory_space<vmem>>, %arg15: memref<1x256xf32, #tpu.memory_space<vmem>>, %arg16: memref<256x128xf32, #tpu.memory_space<vmem>>, %arg17: memref<1x128xf32, #tpu.memory_space<vmem>>, %arg18: memref<1x8x128xf32, #tpu.memory_space<vmem>>) attributes {dimension_semantics = [#tpu.dimension_semantics<parallel>], iteration_bounds = array<i64: 2>, scalar_prefetch = 0 : i64, scratch_operands = 0 : i64, tpu.core_type = #tpu.core_type<tc>, window_params = [{transform_indices = @transform_0, window_bounds = array<i64: 6>}, {transform_indices = @transform_1, window_bounds = array<i64: 1, 8, 128>}, {transform_indices = @transform_2, window_bounds = array<i64: 1, 8, 128>}, {pipeline_mode = #tpu.pipeline_mode<synchronous>, transform_indices = @transform_3, window_bounds = array<i64: 128, 384>}, {pipeline_mode = #tpu.pipeline_mode<synchronous>, transform_indices = @transform_4, window_bounds = array<i64: 1, 384>}, {pipeline_mode = #tpu.pipeline_mode<synchronous>, transform_indices = @transform_5, window_bounds = array<i64: 128, 128>}, {pipeline_mode = #tpu.pipeline_mode<synchronous>, transform_indices = @transform_6, window_bounds = array<i64: 1, 128>}, {pipeline_mode = #tpu.pipeline_mode<synchronous>, transform_indices = @transform_7, window_bounds = array<i64: 128, 128>}, {pipeline_mode = #tpu.pipeline_mode<synchronous>, transform_indices = @transform_8, window_bounds = array<i64: 1, 128>}, {pipeline_mode = #tpu.pipeline_mode<synchronous>, transform_indices = @transform_9, window_bounds = array<i64: 128, 256>}, {pipeline_mode = #tpu.pipeline_mode<synchronous>, transform_indices = @transform_10, window_bounds = array<i64: 1, 256>}, {pipeline_mode = #tpu.pipeline_mode<synchronous>, transform_indices = @transform_11, window_bounds = array<i64: 128, 128>}, {pipeline_mode = #tpu.pipeline_mode<synchronous>, transform_indices = @transform_12, window_bounds = array<i64: 1, 128>}, {pipeline_mode = #tpu.pipeline_mode<synchronous>, transform_indices = @transform_13, window_bounds = array<i64: 128, 256>}, {pipeline_mode = #tpu.pipeline_mode<synchronous>, transform_indices = @transform_14, window_bounds = array<i64: 1, 256>}, {pipeline_mode = #tpu.pipeline_mode<synchronous>, transform_indices = @transform_15, window_bounds = array<i64: 256, 128>}, {pipeline_mode = #tpu.pipeline_mode<synchronous>, transform_indices = @transform_16, window_bounds = array<i64: 1, 128>}, {transform_indices = @transform_17, window_bounds = array<i64: 1, 8, 128>}]} {
    %c0 = arith.constant 0 : index
    %c0_0 = arith.constant 0 : index
    %c0_1 = arith.constant 0 : index
    %0 = vector.load %arg2[%c0, %c0_0, %c0_1] : memref<1x8x128xf32, #tpu.memory_space<vmem>>, vector<1x8x128xf32>
    %1 = vector.shape_cast %0 : vector<1x8x128xf32> to vector<8x128xf32>
    %c0_2 = arith.constant 0 : index
    %c0_3 = arith.constant 0 : index
    %c0_4 = arith.constant 0 : index
    %2 = vector.load %arg3[%c0_2, %c0_3, %c0_4] : memref<1x8x128xf32, #tpu.memory_space<vmem>>, vector<1x8x128xf32>
    %3 = vector.shape_cast %2 : vector<1x8x128xf32> to vector<8x128xf32>
    %c0_5 = arith.constant 0 : index
    %c0_6 = arith.constant 0 : index
    %4 = vector.load %arg4[%c0_5, %c0_6] : memref<128x384xf32, #tpu.memory_space<vmem>>, vector<128x384xf32>
    %cst = arith.constant dense<0.000000e+00> : vector<8x384xf32>
    %5 = tpu.matmul %1, %4, %cst {dimension_numbers = #tpu.dot_dimension_numbers<[1], [0], [0], [1], [0, 0, 1, 1], [], []>} : vector<8x128xf32>, vector<128x384xf32>, vector<8x384xf32> -> vector<8x384xf32>
    %c0_7 = arith.constant 0 : index
    %c0_8 = arith.constant 0 : index
    %6 = vector.load %arg5[%c0_7, %c0_8] : memref<1x384xf32, #tpu.memory_space<vmem>>, vector<1x384xf32>
    %7 = vector.broadcast %6 : vector<1x384xf32> to vector<8x384xf32>
    %8 = arith.addf %5, %7 : vector<8x384xf32>
    %9 = vector.extract_strided_slice %8 {offsets = [0, 0], sizes = [8, 128], strides = [1, 1]} : vector<8x384xf32> to vector<8x128xf32>
    %10 = vector.extract_strided_slice %8 {offsets = [0, 128], sizes = [8, 128], strides = [1, 1]} : vector<8x384xf32> to vector<8x128xf32>
    %11 = vector.extract_strided_slice %8 {offsets = [0, 256], sizes = [8, 128], strides = [1, 1]} : vector<8x384xf32> to vector<8x128xf32>
    %12 = vector.extract_strided_slice %9 {offsets = [0, 0], sizes = [8, 32], strides = [1, 1]} : vector<8x128xf32> to vector<8x32xf32>
    %13 = vector.extract_strided_slice %9 {offsets = [0, 32], sizes = [8, 32], strides = [1, 1]} : vector<8x128xf32> to vector<8x32xf32>
    %14 = vector.extract_strided_slice %9 {offsets = [0, 64], sizes = [8, 32], strides = [1, 1]} : vector<8x128xf32> to vector<8x32xf32>
    %15 = vector.extract_strided_slice %9 {offsets = [0, 96], sizes = [8, 32], strides = [1, 1]} : vector<8x128xf32> to vector<8x32xf32>
    %16 = vector.shape_cast %12 : vector<8x32xf32> to vector<1x8x32xf32>
    %17 = vector.shape_cast %13 : vector<8x32xf32> to vector<1x8x32xf32>
    %18 = vector.shape_cast %14 : vector<8x32xf32> to vector<1x8x32xf32>
    %19 = vector.shape_cast %15 : vector<8x32xf32> to vector<1x8x32xf32>
    %20 = tpu.concatenate %16, %17, %18, %19 in 0 : vector<1x8x32xf32>, vector<1x8x32xf32>, vector<1x8x32xf32>, vector<1x8x32xf32> -> vector<4x8x32xf32>
    %21 = vector.extract_strided_slice %10 {offsets = [0, 0], sizes = [8, 32], strides = [1, 1]} : vector<8x128xf32> to vector<8x32xf32>
    %22 = vector.extract_strided_slice %10 {offsets = [0, 32], sizes = [8, 32], strides = [1, 1]} : vector<8x128xf32> to vector<8x32xf32>
    %23 = vector.extract_strided_slice %10 {offsets = [0, 64], sizes = [8, 32], strides = [1, 1]} : vector<8x128xf32> to vector<8x32xf32>
    %24 = vector.extract_strided_slice %10 {offsets = [0, 96], sizes = [8, 32], strides = [1, 1]} : vector<8x128xf32> to vector<8x32xf32>
    %25 = vector.shape_cast %21 : vector<8x32xf32> to vector<1x8x32xf32>
    %26 = vector.shape_cast %22 : vector<8x32xf32> to vector<1x8x32xf32>
    %27 = vector.shape_cast %23 : vector<8x32xf32> to vector<1x8x32xf32>
    %28 = vector.shape_cast %24 : vector<8x32xf32> to vector<1x8x32xf32>
    %29 = tpu.concatenate %25, %26, %27, %28 in 0 : vector<1x8x32xf32>, vector<1x8x32xf32>, vector<1x8x32xf32>, vector<1x8x32xf32> -> vector<4x8x32xf32>
    %30 = vector.extract_strided_slice %11 {offsets = [0, 0], sizes = [8, 32], strides = [1, 1]} : vector<8x128xf32> to vector<8x32xf32>
    %31 = vector.extract_strided_slice %11 {offsets = [0, 32], sizes = [8, 32], strides = [1, 1]} : vector<8x128xf32> to vector<8x32xf32>
    %32 = vector.extract_strided_slice %11 {offsets = [0, 64], sizes = [8, 32], strides = [1, 1]} : vector<8x128xf32> to vector<8x32xf32>
    %33 = vector.extract_strided_slice %11 {offsets = [0, 96], sizes = [8, 32], strides = [1, 1]} : vector<8x128xf32> to vector<8x32xf32>
    %34 = vector.shape_cast %30 : vector<8x32xf32> to vector<1x8x32xf32>
    %35 = vector.shape_cast %31 : vector<8x32xf32> to vector<1x8x32xf32>
    %36 = vector.shape_cast %32 : vector<8x32xf32> to vector<1x8x32xf32>
    %37 = vector.shape_cast %33 : vector<8x32xf32> to vector<1x8x32xf32>
    %38 = tpu.concatenate %34, %35, %36, %37 in 0 : vector<1x8x32xf32>, vector<1x8x32xf32>, vector<1x8x32xf32>, vector<1x8x32xf32> -> vector<4x8x32xf32>
    %cst_9 = arith.constant dense<0.000000e+00> : vector<4x8x8xf32>
    %39 = tpu.matmul %20, %29, %cst_9 {dimension_numbers = #tpu.dot_dimension_numbers<[2], [2], [1], [1], [0, 0, 0, 1, 1, 1], [0], [0]>} : vector<4x8x32xf32>, vector<4x8x32xf32>, vector<4x8x8xf32> -> vector<4x8x8xf32>
    %cst_10 = arith.constant dense<0xFF800000> : vector<4x8xf32>
    %40 = vector.multi_reduction <maximumf>, %39, %cst_10 [2] : vector<4x8x8xf32> to vector<4x8xf32>
    %41 = vector.shape_cast %40 : vector<4x8xf32> to vector<4x8x1xf32>
    %42 = vector.broadcast %41 : vector<4x8x1xf32> to vector<4x8x8xf32>
    %43 = arith.subf %39, %42 : vector<4x8x8xf32>
    %44 = math.exp %43 : vector<4x8x8xf32>
    %cst_11 = arith.constant dense<0.000000e+00> : vector<4x8xf32>
    %45 = vector.multi_reduction <add>, %44, %cst_11 [2] : vector<4x8x8xf32> to vector<4x8xf32>
    %46 = vector.shape_cast %45 : vector<4x8xf32> to vector<4x8x1xf32>
    %47 = tpu.reciprocal %46 {approx = true} : vector<4x8x1xf32> -> vector<4x8x1xf32>
    %48 = vector.broadcast %47 : vector<4x8x1xf32> to vector<4x8x8xf32>
    %49 = arith.mulf %44, %48 : vector<4x8x8xf32>
    %cst_12 = arith.constant dense<0.000000e+00> : vector<4x8x32xf32>
    %50 = tpu.matmul %49, %38, %cst_12 {dimension_numbers = #tpu.dot_dimension_numbers<[2], [1], [1], [2], [0, 0, 0, 1, 1, 2], [0], [0]>} : vector<4x8x8xf32>, vector<4x8x32xf32>, vector<4x8x32xf32> -> vector<4x8x32xf32>
    %51 = vector.extract_strided_slice %50 {offsets = [0, 0, 0], sizes = [1, 8, 32], strides = [1, 1, 1]} : vector<4x8x32xf32> to vector<1x8x32xf32>
    %52 = vector.shape_cast %51 : vector<1x8x32xf32> to vector<8x32xf32>
    %53 = vector.extract_strided_slice %50 {offsets = [1, 0, 0], sizes = [1, 8, 32], strides = [1, 1, 1]} : vector<4x8x32xf32> to vector<1x8x32xf32>
    %54 = vector.shape_cast %53 : vector<1x8x32xf32> to vector<8x32xf32>
    %55 = vector.extract_strided_slice %50 {offsets = [2, 0, 0], sizes = [1, 8, 32], strides = [1, 1, 1]} : vector<4x8x32xf32> to vector<1x8x32xf32>
    %56 = vector.shape_cast %55 : vector<1x8x32xf32> to vector<8x32xf32>
    %57 = vector.extract_strided_slice %50 {offsets = [3, 0, 0], sizes = [1, 8, 32], strides = [1, 1, 1]} : vector<4x8x32xf32> to vector<1x8x32xf32>
    %58 = vector.shape_cast %57 : vector<1x8x32xf32> to vector<8x32xf32>
    %59 = tpu.concatenate %52, %54, %56, %58 in 1 : vector<8x32xf32>, vector<8x32xf32>, vector<8x32xf32>, vector<8x32xf32> -> vector<8x128xf32>
    %c0_13 = arith.constant 0 : index
    %c0_14 = arith.constant 0 : index
    %60 = vector.load %arg6[%c0_13, %c0_14] : memref<128x128xf32, #tpu.memory_space<vmem>>, vector<128x128xf32>
    %cst_15 = arith.constant dense<0.000000e+00> : vector<8x128xf32>
    %61 = tpu.matmul %59, %60, %cst_15 {dimension_numbers = #tpu.dot_dimension_numbers<[1], [0], [0], [1], [0, 0, 1, 1], [], []>} : vector<8x128xf32>, vector<128x128xf32>, vector<8x128xf32> -> vector<8x128xf32>
    %c0_16 = arith.constant 0 : index
    %c0_17 = arith.constant 0 : index
    %62 = vector.load %arg7[%c0_16, %c0_17] : memref<1x128xf32, #tpu.memory_space<vmem>>, vector<1x128xf32>
    %63 = vector.broadcast %62 : vector<1x128xf32> to vector<8x128xf32>
    %64 = arith.addf %61, %63 : vector<8x128xf32>
    %65 = arith.addf %1, %64 : vector<8x128xf32>
    %c0_18 = arith.constant 0 : index
    %66 = memref.load %arg1[%c0_18] : memref<6xf32, #tpu.memory_space<smem>>
    %c1 = arith.constant 1 : index
    %67 = memref.load %arg1[%c1] : memref<6xf32, #tpu.memory_space<smem>>
    %cst_19 = arith.constant dense<0.000000e+00> : vector<8xf32>
    %68 = vector.multi_reduction <add>, %65, %cst_19 [1] : vector<8x128xf32> to vector<8xf32>
    %69 = vector.shape_cast %68 : vector<8xf32> to vector<8x1xf32>
    %70 = arith.mulf %65, %65 : vector<8x128xf32>
    %cst_20 = arith.constant dense<0.000000e+00> : vector<8xf32>
    %71 = vector.multi_reduction <add>, %70, %cst_20 [1] : vector<8x128xf32> to vector<8xf32>
    %72 = vector.shape_cast %71 : vector<8xf32> to vector<8x1xf32>
    %cst_21 = arith.constant 7.812500e-03 : f32
    %73 = vector.broadcast %cst_21 : f32 to vector<8x1xf32>
    %74 = arith.mulf %69, %73 : vector<8x1xf32>
    %75 = arith.mulf %69, %74 : vector<8x1xf32>
    %76 = arith.subf %72, %75 : vector<8x1xf32>
    %cst_22 = arith.constant 0.000000e+00 : f32
    %77 = vector.broadcast %cst_22 : f32 to vector<8x1xf32>
    %78 = arith.maximumf %76, %77 : vector<8x1xf32>
    %cst_23 = arith.constant 0.00787401571 : f32
    %79 = vector.broadcast %cst_23 : f32 to vector<8x1xf32>
    %80 = arith.mulf %78, %79 : vector<8x1xf32>
    %81 = math.sqrt %80 : vector<8x1xf32>
    %cst_24 = arith.constant 9.99999974E-6 : f32
    %82 = vector.broadcast %cst_24 : f32 to vector<8x1xf32>
    %83 = arith.addf %81, %82 : vector<8x1xf32>
    %84 = tpu.reciprocal %83 : vector<8x1xf32> -> vector<8x1xf32>
    %85 = vector.broadcast %66 : f32 to vector<8x1xf32>
    %86 = arith.mulf %85, %84 : vector<8x1xf32>
    %87 = vector.broadcast %74 : vector<8x1xf32> to vector<8x128xf32>
    %88 = arith.subf %65, %87 : vector<8x128xf32>
    %89 = vector.broadcast %86 : vector<8x1xf32> to vector<8x128xf32>
    %90 = arith.mulf %88, %89 : vector<8x128xf32>
    %91 = vector.broadcast %67 : f32 to vector<8x128xf32>
    %92 = arith.addf %90, %91 : vector<8x128xf32>
    %c0_25 = arith.constant 0 : index
    %c0_26 = arith.constant 0 : index
    %93 = vector.load %arg8[%c0_25, %c0_26] : memref<128x128xf32, #tpu.memory_space<vmem>>, vector<128x128xf32>
    %cst_27 = arith.constant dense<0.000000e+00> : vector<8x128xf32>
    %94 = tpu.matmul %92, %93, %cst_27 {dimension_numbers = #tpu.dot_dimension_numbers<[1], [0], [0], [1], [0, 0, 1, 1], [], []>} : vector<8x128xf32>, vector<128x128xf32>, vector<8x128xf32> -> vector<8x128xf32>
    %c0_28 = arith.constant 0 : index
    %c0_29 = arith.constant 0 : index
    %95 = vector.load %arg9[%c0_28, %c0_29] : memref<1x128xf32, #tpu.memory_space<vmem>>, vector<1x128xf32>
    %96 = vector.broadcast %95 : vector<1x128xf32> to vector<8x128xf32>
    %97 = arith.addf %94, %96 : vector<8x128xf32>
    %c0_30 = arith.constant 0 : index
    %c0_31 = arith.constant 0 : index
    %98 = vector.load %arg10[%c0_30, %c0_31] : memref<128x256xf32, #tpu.memory_space<vmem>>, vector<128x256xf32>
    %cst_32 = arith.constant dense<0.000000e+00> : vector<8x256xf32>
    %99 = tpu.matmul %3, %98, %cst_32 {dimension_numbers = #tpu.dot_dimension_numbers<[1], [0], [0], [1], [0, 0, 1, 1], [], []>} : vector<8x128xf32>, vector<128x256xf32>, vector<8x256xf32> -> vector<8x256xf32>
    %c0_33 = arith.constant 0 : index
    %c0_34 = arith.constant 0 : index
    %100 = vector.load %arg11[%c0_33, %c0_34] : memref<1x256xf32, #tpu.memory_space<vmem>>, vector<1x256xf32>
    %101 = vector.broadcast %100 : vector<1x256xf32> to vector<8x256xf32>
    %102 = arith.addf %99, %101 : vector<8x256xf32>
    %103 = vector.extract_strided_slice %102 {offsets = [0, 0], sizes = [8, 128], strides = [1, 1]} : vector<8x256xf32> to vector<8x128xf32>
    %104 = vector.extract_strided_slice %102 {offsets = [0, 128], sizes = [8, 128], strides = [1, 1]} : vector<8x256xf32> to vector<8x128xf32>
    %105 = vector.extract_strided_slice %97 {offsets = [0, 0], sizes = [8, 32], strides = [1, 1]} : vector<8x128xf32> to vector<8x32xf32>
    %106 = vector.extract_strided_slice %97 {offsets = [0, 32], sizes = [8, 32], strides = [1, 1]} : vector<8x128xf32> to vector<8x32xf32>
    %107 = vector.extract_strided_slice %97 {offsets = [0, 64], sizes = [8, 32], strides = [1, 1]} : vector<8x128xf32> to vector<8x32xf32>
    %108 = vector.extract_strided_slice %97 {offsets = [0, 96], sizes = [8, 32], strides = [1, 1]} : vector<8x128xf32> to vector<8x32xf32>
    %109 = vector.shape_cast %105 : vector<8x32xf32> to vector<1x8x32xf32>
    %110 = vector.shape_cast %106 : vector<8x32xf32> to vector<1x8x32xf32>
    %111 = vector.shape_cast %107 : vector<8x32xf32> to vector<1x8x32xf32>
    %112 = vector.shape_cast %108 : vector<8x32xf32> to vector<1x8x32xf32>
    %113 = tpu.concatenate %109, %110, %111, %112 in 0 : vector<1x8x32xf32>, vector<1x8x32xf32>, vector<1x8x32xf32>, vector<1x8x32xf32> -> vector<4x8x32xf32>
    %114 = vector.extract_strided_slice %103 {offsets = [0, 0], sizes = [8, 32], strides = [1, 1]} : vector<8x128xf32> to vector<8x32xf32>
    %115 = vector.extract_strided_slice %103 {offsets = [0, 32], sizes = [8, 32], strides = [1, 1]} : vector<8x128xf32> to vector<8x32xf32>
    %116 = vector.extract_strided_slice %103 {offsets = [0, 64], sizes = [8, 32], strides = [1, 1]} : vector<8x128xf32> to vector<8x32xf32>
    %117 = vector.extract_strided_slice %103 {offsets = [0, 96], sizes = [8, 32], strides = [1, 1]} : vector<8x128xf32> to vector<8x32xf32>
    %118 = vector.shape_cast %114 : vector<8x32xf32> to vector<1x8x32xf32>
    %119 = vector.shape_cast %115 : vector<8x32xf32> to vector<1x8x32xf32>
    %120 = vector.shape_cast %116 : vector<8x32xf32> to vector<1x8x32xf32>
    %121 = vector.shape_cast %117 : vector<8x32xf32> to vector<1x8x32xf32>
    %122 = tpu.concatenate %118, %119, %120, %121 in 0 : vector<1x8x32xf32>, vector<1x8x32xf32>, vector<1x8x32xf32>, vector<1x8x32xf32> -> vector<4x8x32xf32>
    %123 = vector.extract_strided_slice %104 {offsets = [0, 0], sizes = [8, 32], strides = [1, 1]} : vector<8x128xf32> to vector<8x32xf32>
    %124 = vector.extract_strided_slice %104 {offsets = [0, 32], sizes = [8, 32], strides = [1, 1]} : vector<8x128xf32> to vector<8x32xf32>
    %125 = vector.extract_strided_slice %104 {offsets = [0, 64], sizes = [8, 32], strides = [1, 1]} : vector<8x128xf32> to vector<8x32xf32>
    %126 = vector.extract_strided_slice %104 {offsets = [0, 96], sizes = [8, 32], strides = [1, 1]} : vector<8x128xf32> to vector<8x32xf32>
    %127 = vector.shape_cast %123 : vector<8x32xf32> to vector<1x8x32xf32>
    %128 = vector.shape_cast %124 : vector<8x32xf32> to vector<1x8x32xf32>
    %129 = vector.shape_cast %125 : vector<8x32xf32> to vector<1x8x32xf32>
    %130 = vector.shape_cast %126 : vector<8x32xf32> to vector<1x8x32xf32>
    %131 = tpu.concatenate %127, %128, %129, %130 in 0 : vector<1x8x32xf32>, vector<1x8x32xf32>, vector<1x8x32xf32>, vector<1x8x32xf32> -> vector<4x8x32xf32>
    %cst_35 = arith.constant dense<0.000000e+00> : vector<4x8x8xf32>
    %132 = tpu.matmul %113, %122, %cst_35 {dimension_numbers = #tpu.dot_dimension_numbers<[2], [2], [1], [1], [0, 0, 0, 1, 1, 1], [0], [0]>} : vector<4x8x32xf32>, vector<4x8x32xf32>, vector<4x8x8xf32> -> vector<4x8x8xf32>
    %cst_36 = arith.constant dense<0xFF800000> : vector<4x8xf32>
    %133 = vector.multi_reduction <maximumf>, %132, %cst_36 [2] : vector<4x8x8xf32> to vector<4x8xf32>
    %134 = vector.shape_cast %133 : vector<4x8xf32> to vector<4x8x1xf32>
    %135 = vector.broadcast %134 : vector<4x8x1xf32> to vector<4x8x8xf32>
    %136 = arith.subf %132, %135 : vector<4x8x8xf32>
    %137 = math.exp %136 : vector<4x8x8xf32>
    %cst_37 = arith.constant dense<0.000000e+00> : vector<4x8xf32>
    %138 = vector.multi_reduction <add>, %137, %cst_37 [2] : vector<4x8x8xf32> to vector<4x8xf32>
    %139 = vector.shape_cast %138 : vector<4x8xf32> to vector<4x8x1xf32>
    %140 = tpu.reciprocal %139 {approx = true} : vector<4x8x1xf32> -> vector<4x8x1xf32>
    %141 = vector.broadcast %140 : vector<4x8x1xf32> to vector<4x8x8xf32>
    %142 = arith.mulf %137, %141 : vector<4x8x8xf32>
    %cst_38 = arith.constant dense<0.000000e+00> : vector<4x8x32xf32>
    %143 = tpu.matmul %142, %131, %cst_38 {dimension_numbers = #tpu.dot_dimension_numbers<[2], [1], [1], [2], [0, 0, 0, 1, 1, 2], [0], [0]>} : vector<4x8x8xf32>, vector<4x8x32xf32>, vector<4x8x32xf32> -> vector<4x8x32xf32>
    %144 = vector.extract_strided_slice %143 {offsets = [0, 0, 0], sizes = [1, 8, 32], strides = [1, 1, 1]} : vector<4x8x32xf32> to vector<1x8x32xf32>
    %145 = vector.shape_cast %144 : vector<1x8x32xf32> to vector<8x32xf32>
    %146 = vector.extract_strided_slice %143 {offsets = [1, 0, 0], sizes = [1, 8, 32], strides = [1, 1, 1]} : vector<4x8x32xf32> to vector<1x8x32xf32>
    %147 = vector.shape_cast %146 : vector<1x8x32xf32> to vector<8x32xf32>
    %148 = vector.extract_strided_slice %143 {offsets = [2, 0, 0], sizes = [1, 8, 32], strides = [1, 1, 1]} : vector<4x8x32xf32> to vector<1x8x32xf32>
    %149 = vector.shape_cast %148 : vector<1x8x32xf32> to vector<8x32xf32>
    %150 = vector.extract_strided_slice %143 {offsets = [3, 0, 0], sizes = [1, 8, 32], strides = [1, 1, 1]} : vector<4x8x32xf32> to vector<1x8x32xf32>
    %151 = vector.shape_cast %150 : vector<1x8x32xf32> to vector<8x32xf32>
    %152 = tpu.concatenate %145, %147, %149, %151 in 1 : vector<8x32xf32>, vector<8x32xf32>, vector<8x32xf32>, vector<8x32xf32> -> vector<8x128xf32>
    %c0_39 = arith.constant 0 : index
    %c0_40 = arith.constant 0 : index
    %153 = vector.load %arg12[%c0_39, %c0_40] : memref<128x128xf32, #tpu.memory_space<vmem>>, vector<128x128xf32>
    %cst_41 = arith.constant dense<0.000000e+00> : vector<8x128xf32>
    %154 = tpu.matmul %152, %153, %cst_41 {dimension_numbers = #tpu.dot_dimension_numbers<[1], [0], [0], [1], [0, 0, 1, 1], [], []>} : vector<8x128xf32>, vector<128x128xf32>, vector<8x128xf32> -> vector<8x128xf32>
    %c0_42 = arith.constant 0 : index
    %c0_43 = arith.constant 0 : index
    %155 = vector.load %arg13[%c0_42, %c0_43] : memref<1x128xf32, #tpu.memory_space<vmem>>, vector<1x128xf32>
    %156 = vector.broadcast %155 : vector<1x128xf32> to vector<8x128xf32>
    %157 = arith.addf %154, %156 : vector<8x128xf32>
    %158 = arith.addf %92, %157 : vector<8x128xf32>
    %c2 = arith.constant 2 : index
    %159 = memref.load %arg1[%c2] : memref<6xf32, #tpu.memory_space<smem>>
    %c3 = arith.constant 3 : index
    %160 = memref.load %arg1[%c3] : memref<6xf32, #tpu.memory_space<smem>>
    %cst_44 = arith.constant dense<0.000000e+00> : vector<8xf32>
    %161 = vector.multi_reduction <add>, %158, %cst_44 [1] : vector<8x128xf32> to vector<8xf32>
    %162 = vector.shape_cast %161 : vector<8xf32> to vector<8x1xf32>
    %163 = arith.mulf %158, %158 : vector<8x128xf32>
    %cst_45 = arith.constant dense<0.000000e+00> : vector<8xf32>
    %164 = vector.multi_reduction <add>, %163, %cst_45 [1] : vector<8x128xf32> to vector<8xf32>
    %165 = vector.shape_cast %164 : vector<8xf32> to vector<8x1xf32>
    %cst_46 = arith.constant 7.812500e-03 : f32
    %166 = vector.broadcast %cst_46 : f32 to vector<8x1xf32>
    %167 = arith.mulf %162, %166 : vector<8x1xf32>
    %168 = arith.mulf %162, %167 : vector<8x1xf32>
    %169 = arith.subf %165, %168 : vector<8x1xf32>
    %cst_47 = arith.constant 0.000000e+00 : f32
    %170 = vector.broadcast %cst_47 : f32 to vector<8x1xf32>
    %171 = arith.maximumf %169, %170 : vector<8x1xf32>
    %cst_48 = arith.constant 0.00787401571 : f32
    %172 = vector.broadcast %cst_48 : f32 to vector<8x1xf32>
    %173 = arith.mulf %171, %172 : vector<8x1xf32>
    %174 = math.sqrt %173 : vector<8x1xf32>
    %cst_49 = arith.constant 9.99999974E-6 : f32
    %175 = vector.broadcast %cst_49 : f32 to vector<8x1xf32>
    %176 = arith.addf %174, %175 : vector<8x1xf32>
    %177 = tpu.reciprocal %176 : vector<8x1xf32> -> vector<8x1xf32>
    %178 = vector.broadcast %159 : f32 to vector<8x1xf32>
    %179 = arith.mulf %178, %177 : vector<8x1xf32>
    %180 = vector.broadcast %167 : vector<8x1xf32> to vector<8x128xf32>
    %181 = arith.subf %158, %180 : vector<8x128xf32>
    %182 = vector.broadcast %179 : vector<8x1xf32> to vector<8x128xf32>
    %183 = arith.mulf %181, %182 : vector<8x128xf32>
    %184 = vector.broadcast %160 : f32 to vector<8x128xf32>
    %185 = arith.addf %183, %184 : vector<8x128xf32>
    %c0_50 = arith.constant 0 : index
    %c0_51 = arith.constant 0 : index
    %186 = vector.load %arg14[%c0_50, %c0_51] : memref<128x256xf32, #tpu.memory_space<vmem>>, vector<128x256xf32>
    %cst_52 = arith.constant dense<0.000000e+00> : vector<8x256xf32>
    %187 = tpu.matmul %185, %186, %cst_52 {dimension_numbers = #tpu.dot_dimension_numbers<[1], [0], [0], [1], [0, 0, 1, 1], [], []>} : vector<8x128xf32>, vector<128x256xf32>, vector<8x256xf32> -> vector<8x256xf32>
    %c0_53 = arith.constant 0 : index
    %c0_54 = arith.constant 0 : index
    %188 = vector.load %arg15[%c0_53, %c0_54] : memref<1x256xf32, #tpu.memory_space<vmem>>, vector<1x256xf32>
    %189 = vector.broadcast %188 : vector<1x256xf32> to vector<8x256xf32>
    %190 = arith.addf %187, %189 : vector<8x256xf32>
    %cst_55 = arith.constant 0.000000e+00 : f32
    %191 = vector.broadcast %cst_55 : f32 to vector<8x256xf32>
    %192 = arith.maximumf %190, %191 : vector<8x256xf32>
    %c0_56 = arith.constant 0 : index
    %c0_57 = arith.constant 0 : index
    %193 = vector.load %arg16[%c0_56, %c0_57] : memref<256x128xf32, #tpu.memory_space<vmem>>, vector<256x128xf32>
    %cst_58 = arith.constant dense<0.000000e+00> : vector<8x128xf32>
    %194 = tpu.matmul %192, %193, %cst_58 {dimension_numbers = #tpu.dot_dimension_numbers<[1], [0], [0], [1], [0, 0, 1, 1], [], []>} : vector<8x256xf32>, vector<256x128xf32>, vector<8x128xf32> -> vector<8x128xf32>
    %c0_59 = arith.constant 0 : index
    %c0_60 = arith.constant 0 : index
    %195 = vector.load %arg17[%c0_59, %c0_60] : memref<1x128xf32, #tpu.memory_space<vmem>>, vector<1x128xf32>
    %196 = vector.broadcast %195 : vector<1x128xf32> to vector<8x128xf32>
    %197 = arith.addf %194, %196 : vector<8x128xf32>
    %198 = arith.addf %185, %197 : vector<8x128xf32>
    %c4 = arith.constant 4 : index
    %199 = memref.load %arg1[%c4] : memref<6xf32, #tpu.memory_space<smem>>
    %c5 = arith.constant 5 : index
    %200 = memref.load %arg1[%c5] : memref<6xf32, #tpu.memory_space<smem>>
    %cst_61 = arith.constant dense<0.000000e+00> : vector<8xf32>
    %201 = vector.multi_reduction <add>, %198, %cst_61 [1] : vector<8x128xf32> to vector<8xf32>
    %202 = vector.shape_cast %201 : vector<8xf32> to vector<8x1xf32>
    %203 = arith.mulf %198, %198 : vector<8x128xf32>
    %cst_62 = arith.constant dense<0.000000e+00> : vector<8xf32>
    %204 = vector.multi_reduction <add>, %203, %cst_62 [1] : vector<8x128xf32> to vector<8xf32>
    %205 = vector.shape_cast %204 : vector<8xf32> to vector<8x1xf32>
    %cst_63 = arith.constant 7.812500e-03 : f32
    %206 = vector.broadcast %cst_63 : f32 to vector<8x1xf32>
    %207 = arith.mulf %202, %206 : vector<8x1xf32>
    %208 = arith.mulf %202, %207 : vector<8x1xf32>
    %209 = arith.subf %205, %208 : vector<8x1xf32>
    %cst_64 = arith.constant 0.000000e+00 : f32
    %210 = vector.broadcast %cst_64 : f32 to vector<8x1xf32>
    %211 = arith.maximumf %209, %210 : vector<8x1xf32>
    %cst_65 = arith.constant 0.00787401571 : f32
    %212 = vector.broadcast %cst_65 : f32 to vector<8x1xf32>
    %213 = arith.mulf %211, %212 : vector<8x1xf32>
    %214 = math.sqrt %213 : vector<8x1xf32>
    %cst_66 = arith.constant 9.99999974E-6 : f32
    %215 = vector.broadcast %cst_66 : f32 to vector<8x1xf32>
    %216 = arith.addf %214, %215 : vector<8x1xf32>
    %217 = tpu.reciprocal %216 : vector<8x1xf32> -> vector<8x1xf32>
    %218 = vector.broadcast %199 : f32 to vector<8x1xf32>
    %219 = arith.mulf %218, %217 : vector<8x1xf32>
    %220 = vector.broadcast %207 : vector<8x1xf32> to vector<8x128xf32>
    %221 = arith.subf %198, %220 : vector<8x128xf32>
    %222 = vector.broadcast %219 : vector<8x1xf32> to vector<8x128xf32>
    %223 = arith.mulf %221, %222 : vector<8x128xf32>
    %224 = vector.broadcast %200 : f32 to vector<8x128xf32>
    %225 = arith.addf %223, %224 : vector<8x128xf32>
    %c0_67 = arith.constant 0 : index
    %c0_68 = arith.constant 0 : index
    %c0_69 = arith.constant 0 : index
    %226 = vector.load %arg18[%c0_67, %c0_68, %c0_69] : memref<1x8x128xf32, #tpu.memory_space<vmem>>, vector<1x8x128xf32>
    %227 = vector.shape_cast %226 : vector<1x8x128xf32> to vector<8x128xf32>
    %228 = vector.shape_cast %225 : vector<8x128xf32> to vector<1x8x128xf32>
    tpu.vector_store %arg18[%c0_67, %c0_68, %c0_69], %228 {strides = array<i32>} : memref<1x8x128xf32, #tpu.memory_space<vmem>>, vector<1x8x128xf32>,
    return
  }
  func.func @transform_0(%arg0: i32) -> i32 {
    %c0_i32 = arith.constant 0 : i32
    %c0_i32_0 = arith.constant 0 : i32
    return %c0_i32 : i32
  }
  func.func @transform_1(%arg0: i32) -> (i32, i32, i32) {
    %c0_i32 = arith.constant 0 : i32
    %c0_i32_0 = arith.constant 0 : i32
    %c0_i32_1 = arith.constant 0 : i32
    return %arg0, %c0_i32, %c0_i32_0 : i32, i32, i32
  }
  func.func @transform_2(%arg0: i32) -> (i32, i32, i32) {
    %c0_i32 = arith.constant 0 : i32
    %c0_i32_0 = arith.constant 0 : i32
    %c0_i32_1 = arith.constant 0 : i32
    return %arg0, %c0_i32, %c0_i32_0 : i32, i32, i32
  }
  func.func @transform_3(%arg0: i32) -> (i32, i32) {
    %c0_i32 = arith.constant 0 : i32
    %c0_i32_0 = arith.constant 0 : i32
    %c0_i32_1 = arith.constant 0 : i32
    return %c0_i32, %c0_i32_0 : i32, i32
  }
  func.func @transform_4(%arg0: i32) -> (i32, i32) {
    %c0_i32 = arith.constant 0 : i32
    %c0_i32_0 = arith.constant 0 : i32
    %c0_i32_1 = arith.constant 0 : i32
    return %c0_i32, %c0_i32_0 : i32, i32
  }
  func.func @transform_5(%arg0: i32) -> (i32, i32) {
    %c0_i32 = arith.constant 0 : i32
    %c0_i32_0 = arith.constant 0 : i32
    %c0_i32_1 = arith.constant 0 : i32
    return %c0_i32, %c0_i32_0 : i32, i32
  }
  func.func @transform_6(%arg0: i32) -> (i32, i32) {
    %c0_i32 = arith.constant 0 : i32
    %c0_i32_0 = arith.constant 0 : i32
    %c0_i32_1 = arith.constant 0 : i32
    return %c0_i32, %c0_i32_0 : i32, i32
  }
  func.func @transform_7(%arg0: i32) -> (i32, i32) {
    %c0_i32 = arith.constant 0 : i32
    %c0_i32_0 = arith.constant 0 : i32
    %c0_i32_1 = arith.constant 0 : i32
    return %c0_i32, %c0_i32_0 : i32, i32
  }
  func.func @transform_8(%arg0: i32) -> (i32, i32) {
    %c0_i32 = arith.constant 0 : i32
    %c0_i32_0 = arith.constant 0 : i32
    %c0_i32_1 = arith.constant 0 : i32
    return %c0_i32, %c0_i32_0 : i32, i32
  }
  func.func @transform_9(%arg0: i32) -> (i32, i32) {
    %c0_i32 = arith.constant 0 : i32
    %c0_i32_0 = arith.constant 0 : i32
    %c0_i32_1 = arith.constant 0 : i32
    return %c0_i32, %c0_i32_0 : i32, i32
  }
  func.func @transform_10(%arg0: i32) -> (i32, i32) {
    %c0_i32 = arith.constant 0 : i32
    %c0_i32_0 = arith.constant 0 : i32
    %c0_i32_1 = arith.constant 0 : i32
    return %c0_i32, %c0_i32_0 : i32, i32
  }
  func.func @transform_11(%arg0: i32) -> (i32, i32) {
    %c0_i32 = arith.constant 0 : i32
    %c0_i32_0 = arith.constant 0 : i32
    %c0_i32_1 = arith.constant 0 : i32
    return %c0_i32, %c0_i32_0 : i32, i32
  }
  func.func @transform_12(%arg0: i32) -> (i32, i32) {
    %c0_i32 = arith.constant 0 : i32
    %c0_i32_0 = arith.constant 0 : i32
    %c0_i32_1 = arith.constant 0 : i32
    return %c0_i32, %c0_i32_0 : i32, i32
  }
  func.func @transform_13(%arg0: i32) -> (i32, i32) {
    %c0_i32 = arith.constant 0 : i32
    %c0_i32_0 = arith.constant 0 : i32
    %c0_i32_1 = arith.constant 0 : i32
    return %c0_i32, %c0_i32_0 : i32, i32
  }
  func.func @transform_14(%arg0: i32) -> (i32, i32) {
    %c0_i32 = arith.constant 0 : i32
    %c0_i32_0 = arith.constant 0 : i32
    %c0_i32_1 = arith.constant 0 : i32
    return %c0_i32, %c0_i32_0 : i32, i32
  }
  func.func @transform_15(%arg0: i32) -> (i32, i32) {
    %c0_i32 = arith.constant 0 : i32
    %c0_i32_0 = arith.constant 0 : i32
    %c0_i32_1 = arith.constant 0 : i32
    return %c0_i32, %c0_i32_0 : i32, i32
  }
  func.func @transform_16(%arg0: i32) -> (i32, i32) {
    %c0_i32 = arith.constant 0 : i32
    %c0_i32_0 = arith.constant 0 : i32
    %c0_i32_1 = arith.constant 0 : i32
    return %c0_i32, %c0_i32_0 : i32, i32
  }
  func.func @transform_17(%arg0: i32) -> (i32, i32, i32) {
    %c0_i32 = arith.constant 0 : i32
    %c0_i32_0 = arith.constant 0 : i32
    %c0_i32_1 = arith.constant 0 : i32
    return %arg0, %c0_i32, %c0_i32_0 : i32, i32, i32
  }
}

</mosaic_0001>

<bundles_post_ra>
// kernel: tpu_custom_call.1
= control target key start
LH: loop header
LB: loop body
LE: loop exit
PB: predicated region body
PF: predicated region fallthrough
CT: control target
= control target key end

     0   :  { %s3336_s0 = inlined_call_operand.hbm [shape: f32[6], index: 0, kind: input, shape index: {}]   ;;  %s3337_s1 = inlined_call_operand.hbm [shape: f32[2,8,128], index: 1, kind: input, shape index: {}]   ;;  %s3338_s2 = inlined_call_operand.hbm [shape: f32[2,8,128], index: 2, kind: input, shape index: {}]   ;;  %s3339_s3 = inlined_call_operand.hbm [shape: f32[128,384], index: 3, kind: input, shape index: {}]   ;;  %s3340_s4 = inlined_call_operand.vmem [shape: f32[1,384], index: 4, kind: input, shape index: {}]   ;;  %s3341_s5 = inlined_call_operand.hbm [shape: f32[128,128], index: 5, kind: input, shape index: {}]   ;;  %s3342_s6 = inlined_call_operand.hbm [shape: f32[1,128], index: 6, kind: input, shape index: {}]   ;;  %s3343_s7 = inlined_call_operand.hbm [shape: f32[128,128], index: 7, kind: input, shape index: {}]   ;;  %s3344_s8 = inlined_call_operand.hbm [shape: f32[1,128], index: 8, kind: input, shape index: {}]   ;;  %s3345_s9 = inlined_call_operand.hbm [shape: f32[128,256], index: 9, kind: input, shape index: {}]   ;;  %s3346_s10 = inlined_call_operand.vmem [shape: f32[1,256], index: 10, kind: input, shape index: {}]   ;;  %s3347_s11 = inlined_call_operand.hbm [shape: f32[128,128], index: 11, kind: input, shape index: {}]   ;;  %s3348_s12 = inlined_call_operand.vmem [shape: f32[1,128], index: 12, kind: input, shape index: {}]   ;;  %s3349_s13 = inlined_call_operand.hbm [shape: f32[128,256], index: 13, kind: input, shape index: {}]   ;;  %s3350_s14 = inlined_call_operand.vmem [shape: f32[1,256], index: 14, kind: input, shape index: {}]   ;;  %s3351_s15 = inlined_call_operand.hbm [shape: f32[256,128], index: 15, kind: input, shape index: {}]   ;;  %s3352_s16 = inlined_call_operand.vmem [shape: f32[1,128], index: 16, kind: input, shape index: {}]   ;;  %s3353_s17 = inlined_call_operand.hbm [shape: f32[2,8,128], index: 17, kind: output, shape index: {}]  }
   0x1   :  { %3360 = sst [smem:[#allocation33_spill]] %s3336_s0 }
   0x2   :  { %3361 = sst [smem:[#allocation34_spill]] %s3337_s1 }
   0x3   :  { %3362 = sst [smem:[#allocation35_spill]] %s3339_s3 }
   0x4   :  { %3363 = sst [smem:[#allocation36_spill]] %s3341_s5 }
   0x5   :  { %3364 = sst [smem:[#allocation37_spill]] %s3342_s6 }
   0x6   :  { %3365 = sst [smem:[#allocation38_spill]] %s3343_s7 }
   0x7   :  { %3366 = sst [smem:[#allocation39_spill]] %s3344_s8 }
   0x8   :  { %3367 = sst [smem:[#allocation40_spill]] %s3345_s9 }
   0x9   :  { %3368 = sst [smem:[#allocation41_spill]] %s3346_s10 }
   0xa   :  { %3369 = sst [smem:[#allocation42_spill]] %s3347_s11 }
   0xb   :  { %3370 = sst [smem:[#allocation43_spill]] %s3348_s12 }
   0xc   :  { %3371 = sst [smem:[#allocation44_spill]] %s3349_s13 }
   0xd   :  { %3372 = sst [smem:[#allocation45_spill]] %s3350_s14 }
   0xe   :  { %3373 = sst [smem:[#allocation46_spill]] %s3351_s15 }
   0xf   :  { %3374 = sst [smem:[#allocation47_spill]] %s3352_s16 }
  0x10   :  { %3375 = sst [smem:[#allocation48_spill]] %s3353_s17 }
  0x11   :  { %22 = vsyncpa [#allocation5], 0 }
  0x12   :  { %23 = vsyncpa [#allocation3], 0 }
  0x13   :  { %25 = vsyncpa [#allocation3 + $0x1], 0 }
  0x14   :  { %26 = vsyncpa [#allocation8], 0 }
  0x15   :  { %28 = vsyncpa [#allocation8 + $0x1], 0 }
  0x16   :  { %29 = vsyncpa [#allocation11], 0 }
  0x17   :  { %30 = vsyncpa [#allocation14], 0 }
  0x18   :  { %31 = vsyncpa [#allocation17], 0 }
  0x19   :  { %32 = vsyncpa [#allocation20], 0 }
  0x1a   :  { %33 = vsyncpa [#allocation4], 0 }
  0x1b   :  { %35 = vsyncpa [#allocation4 + $0x1], 0  ;;  %s2949_s24 = smov 0   ;;  %s2951_s25 = smov 0  }
  0x1c   :  { %s2953_s26 = smov 0   ;;  %s2955_s27 = smov 0  }
  0x1d LB: > { %s3376_s3 = sld [smem:[#allocation35_spill]]  ;;  %s2973_s30 = sadd.s32 4294967295, %s2838_s27   ;;  %s2838_s27 = sphi %s2955_s27, %s3407_s27   ;;  %s2834_s26 = sphi %s2953_s26, %s3406_s26   ;;  %s2830_s25 = sphi %s2951_s25, %s3405_s25   ;;  %s2826_s24 = sphi %s2949_s24, %s3404_s24  }
  0x1e   : > { %p2127_p0 = scmp.ge.s32.totalorder %s2838_s27, 1  ;;  %p83_p1 = scmp.eq.s32.totalorder %s2973_s30, 0 }
  0x1f   : > { %p439_p2 = scmp.lt.s32.totalorder %s2838_s27, 3  ;;  %s2840_s19 = smov [#allocation9]  }
  0x20   : > { %s462_s1 = sshll.u32 %s2840_s19, 4  ;;  %s3378_s5 = sld [smem:[#allocation36_spill]]  ;;  %s463_s1 = int_to_ptr.vmem [resolvable:$true] %s462_s1 }
  0x21   : > { %p2978_p3 = pnand %p2127_p0, %p439_p2  ;;  %s2841_s28 = smov [#allocation10]  }
  0x22   : > { %s479_s29 = sshll.u32 %s2841_s28, 4  ;;  %s2842_s19 = smov 384   ;;  %s480_s29 = int_to_ptr.vmem [resolvable:$true] %s479_s29 }
  0x23   : > { %s460_s0 = sshll.u32 %s3376_s3, 4  ;;  %p2236_p4 = pneg %p2978_p3  ;;  %s461_s0 = int_to_ptr.hbm [resolvable:$true] %s460_s0 }
  0x24   : > { %s2843_s3 = smov 24   ;;  %s3356_s17 = smov 128  }
  0x25   : > { %p2990_p6 = pnand %p2236_p4, %p83_p1  ;;  %s3358_s20 = smov 8  }
  0x26   : > { %s477_s22 = sshll.u32 %s3378_s5, 4  ;;  %s3380_s7 = sld [smem:[#allocation38_spill]]  ;;  %s478_s22 = int_to_ptr.hbm [resolvable:$true] %s477_s22 }
  0x27   : > { %2242 = dma.hbm_to_vmem [thread:$0]  (!%p2990_p6), %s461_s0, 6144, %s463_s1, [#allocation8], %s2842_s19, %s2842_s19, %s2843_s3  }
  0x28   : > { %2245 = dma.hbm_to_vmem [thread:$0]  (!%p2990_p6), %s478_s22, 2048, %s480_s29, [#allocation11], %s3356_s17, %s3356_s17, %s3358_s20  }
  0x29   : > { %s2846_s14 = smov [#allocation13]   ;;  %s3381_s9 = sld [smem:[#allocation40_spill]] }
  0x2a   : > { %s505_s28 = sshll.u32 %s2846_s14, 4  ;;  %s2847_s0 = smov [#allocation16]   ;;  %s506_s28 = int_to_ptr.vmem [resolvable:$true] %s505_s28 }
  0x2b   : > { %s531_s1 = sshll.u32 %s2847_s0, 4  ;;  %s2848_s5 = smov 256   ;;  %s532_s1 = int_to_ptr.vmem [resolvable:$true] %s531_s1 }
  0x2c   : > { %s503_s16 = sshll.u32 %s3380_s7, 4  ;;  %s2849_s22 = smov 16   ;;  %s504_s16 = int_to_ptr.hbm [resolvable:$true] %s503_s16 }
  0x2d   : > { %2251 = dma.hbm_to_vmem [thread:$0]  (!%p2990_p6), %s504_s16, 2048, %s506_s28, [#allocation14], %s3356_s17, %s3356_s17, %s3358_s20  }
  0x2e   : > { %s3382_s13 = sld [smem:[#allocation44_spill]]  ;;  %s2850_s12 = smov [#allocation19]  }
  0x2f   : > { %s529_s3 = sshll.u32 %s3381_s9, 4  ;;  %s565_s19 = sshll.u32 %s2850_s12, 4  ;;  %s530_s3 = int_to_ptr.hbm [resolvable:$true] %s529_s3  ;;  %s566_s19 = int_to_ptr.vmem [resolvable:$true] %s565_s19 }
  0x30   : > { %2257 = dma.hbm_to_vmem [thread:$0]  (!%p2990_p6), %s530_s3, 4096, %s532_s1, [#allocation17], %s2848_s5, %s2848_s5, %s2849_s22  }
  0x31   : > { %s3383_s28 = sld [smem:[#allocation33_spill]]  ;;  %s2851_s0 = smov [#allocation2]  }
  0x32   : > { %s3384_s6 = sld [smem:[#allocation37_spill]]  ;;  %s2852_s29 = smov [#allocation12]  }
  0x33   : > { %s494_s20 = sshll.u32 %s2852_s29, 4  ;;  %s3385_s8 = sld [smem:[#allocation39_spill]]  ;;  %s495_s20 = int_to_ptr.vmem [resolvable:$true] %s494_s20 }
  0x34   : > { %s563_s10 = sshll.u32 %s3382_s13, 4  ;;  %s3386_s11 = sld [smem:[#allocation42_spill]]  ;;  %s564_s10 = int_to_ptr.hbm [resolvable:$true] %s563_s10 }
  0x35   : > { %2263 = dma.hbm_to_vmem [thread:$0]  (!%p2990_p6), %s564_s10, 4096, %s566_s19, [#allocation20], %s2848_s5, %s2848_s5, %s2849_s22  }
  0x36   : > { %s2853_s5 = smov [#allocation15]   ;;  %s3387_s15 = sld [smem:[#allocation46_spill]] }
  0x37   : > { %s451_s17 = sshll.u32 %s3383_s28, 4  ;;  %s2854_s28 = smov [#allocation18]   ;;  %s452_s17 = int_to_ptr.hbm [resolvable:$true] %s451_s17 }
  0x38   : > { %2239 = dma.hbm_to_smem (!%p2990_p6), %s452_s17, 16, %s2851_s0, [#allocation5]  }
  0x39   : > { %s492_s14 = sshll.u32 %s3384_s6, 4  ;;  %s518_s21 = sshll.u32 %s3385_s8, 4  ;;  %s493_s14 = int_to_ptr.hbm [resolvable:$true] %s492_s14  ;;  %s519_s21 = int_to_ptr.hbm [resolvable:$true] %s518_s21 }
  0x3a   : > { %2248 = dma.hbm_to_vmem [thread:$0]  (!%p2990_p6), %s493_s14, 16, %s495_s20, [#allocation11]  }
  0x3b   : > { %s520_s17 = sshll.u32 %s2853_s5, 4  ;;  %s546_s19 = sshll.u32 %s3386_s11, 4  ;;  %s521_s17 = int_to_ptr.vmem [resolvable:$true] %s520_s17  ;;  %s547_s19 = int_to_ptr.hbm [resolvable:$true] %s546_s19 }
  0x3c   : > { %2254 = dma.hbm_to_vmem [thread:$0]  (!%p2990_p6), %s519_s21, 16, %s521_s17, [#allocation14]  }
  0x3d   : > { %s580_s20 = sshll.u32 %s3387_s15, 4  ;;  %s548_s0 = sshll.u32 %s2854_s28, 4  ;;  %s581_s20 = int_to_ptr.hbm [resolvable:$true] %s580_s20  ;;  %s549_s0 = int_to_ptr.vmem [resolvable:$true] %s548_s0 }
  0x3e   : > { %s3388_s3 = smov 8   ;;  %s3389_s1 = smov 128  }
  0x3f   : > { %2260 = dma.hbm_to_vmem [thread:$0]  (!%p2990_p6), %s547_s19, 2048, %s549_s0, [#allocation17], %s3389_s1, %s3389_s1, %s3388_s3  }
  0x40   : > { %s2855_s14 = smov [#allocation21]   ;;  %s2126_s12 = sadd.s32 4294967294, %s2838_s27  }
  0x41   : > { %s582_s29 = sshll.u32 %s2855_s14, 4  ;;  %s3052_s21 = sadd.s32 1, %s2838_s27   ;;  %s583_s29 = int_to_ptr.vmem [resolvable:$true] %s582_s29 }
  0x42   : > { %2266 = dma.hbm_to_vmem [thread:$0]  (!%p2990_p6), %s581_s20, 4096, %s583_s29, [#allocation20], %s3389_s1, %s3389_s1, %s3388_s3  }
  0x43   : > { %s66_s5 = ssub.s32 %s2838_s27, %s3052_s21  ;;  %s69_s17 = sadd.s32 1, %s2834_s26 }
  0x44   : > { %p67_p7 = scmp.eq.s32.totalorder %s66_s5, 0  ;;  %p76_p8 = scmp.ne.s32.totalorder %s2834_s26, %s2830_s25 }
  0x45   : > { %p77_p9 = scmp.eq.s32.totalorder %s2838_s27, 0  ;;  %p82_p10 = scmp.ne.s32.totalorder %s2830_s25, %s2826_s24 }
  0x46   : > { %s3063_s22 = scalar_select %p67_p7, %s2834_s26, %s69_s17  }
  0x47   : > { %p3065_p11 = por %p77_p9, %p76_p8  ;;  %p3071_p12 = por %p83_p1, %p82_p10 }
  0x48   : > { %3390 = sst [smem:[#allocation32_spill]] %s3063_s22  ;;  %p426_p13 = scmp.eq.s32.totalorder %s2973_s30, 1 }
  0x49   : > { %p432_p0 = scmp.eq.s32.totalorder %s2126_s12, 1  ;;  %p2288_p2 = scmp.lt.s32.totalorder %s2838_s27, 2 }
  0x4a   : > { %s599_s19 = sand.u32 1, %s2834_s26   ;;  %p3078_p4 = por %p426_p13, %p76_p8 }
  0x4b   : > { %p3082_p6 = por %p432_p0, %p82_p10  ;;  %s3086_s20 = sshll.u32 %s599_s19, 3 }
  0x4c   : > { %s2140_s28 = sshll.u32 %s2838_s27, 3  ;;  %s3395_s1 = sld [smem:[#allocation34_spill]] }
  0x4d   : > { %s603_s29 = scalar_lea.vmem [#allocation6], %s3086_s20  ;;  %p3095_p7 = pnand %p2288_p2, %p3065_p11 }
  0x4e   : > { %s611_s12 = sshll.u32 %s603_s29, 4  ;;  %s626_s9 = scalar_lea.hbm %s3338_s2, %s2140_s28  ;;  %s612_s12 = int_to_ptr.vmem [resolvable:$true] %s611_s12 }
  0x4f   : > { %s618_s11 = sand.u32 1, %s2838_s27   ;;  %s600_s13 = scalar_lea.sflag [#allocation3], %s599_s19 }
  0x50   : > { %p2688_p9 = pneg %p3095_p7 }
  0x52   : > { %s607_s14 = scalar_lea.hbm %s3395_s1, %s2140_s28  ;;  %s2691_s29 = scalar_lea.hbm %s3395_s1, 16 }
  0x53   : > { %s609_s5 = sshll.u32 %s607_s14, 4  ;;  %s610_s5 = int_to_ptr.hbm [resolvable:$true] %s609_s5 }
  0x54   : > { %s2684_s0 = sshra.s32 %s610_s5, 4  ;;  %s2685_s0 = int_to_ptr.hbm [resolvable:$true] %s2684_s0 }
  0x55   : > { %s2686_s3 = scalar_lea.hbm %s2685_s0, 8  ;;  %p2692_p13 = scmp.lt.s32.totalorder %s2685_s0, %s3395_s1 }
  0x56   : > { %p2687_p8 = scmp.ne.s32.totalorder %s2685_s0, %s2686_s3  ;;  %p2693_p0 = scmp.lt.s32.totalorder %s2691_s29, %s2686_s3 }
  0x58   : > { %p2689_p10 = pnand %p2688_p9, %p2687_p8  ;;  %p2694_p2 = por %p2693_p0, %p2692_p13 }
  0x5a   : > { %p2690_p11 = pneg %p2689_p10 }
  0x5c   : > { %p2695_p5 = pnand %p2694_p2, %p2690_p11 }
  0x5e   : > { %2698 = shalt.err (!%p2695_p5)
}
  0x5f   : > { %2270 = dma.hbm_to_vmem [thread:$0]  (!%p3095_p7), %s610_s5, 128, %s612_s12, %s600_s13  }
  0x60   : > { %s628_s19 = sshll.u32 %s626_s9, 4  ;;  %s622_s28 = scalar_lea.vmem [#allocation7], %s3086_s20  ;;  %s629_s19 = int_to_ptr.hbm [resolvable:$true] %s628_s19 }
  0x61   : > { %s630_s15 = sshll.u32 %s622_s28, 4  ;;  %s619_s23 = scalar_lea.sflag [#allocation8], %s618_s11  ;;  %s631_s15 = int_to_ptr.vmem [resolvable:$true] %s630_s15 }
  0x62   : > { %s2714_s14 = sshra.s32 %s629_s19, 4  ;;  %s2721_s29 = scalar_lea.hbm %s3338_s2, 16  ;;  %s2715_s14 = int_to_ptr.hbm [resolvable:$true] %s2714_s14 }
  0x63   : > { %s2716_s22 = scalar_lea.hbm %s2715_s14, 8  ;;  %p2722_p5 = scmp.lt.s32.totalorder %s2715_s14, %s3338_s2 }
  0x64   : > { %p2717_p8 = scmp.ne.s32.totalorder %s2715_s14, %s2716_s22  ;;  %p2723_p13 = scmp.lt.s32.totalorder %s2721_s29, %s2716_s22 }
  0x66   : > { %p2719_p10 = pnand %p2717_p8, %p2688_p9  ;;  %p2724_p0 = por %p2723_p13, %p2722_p5 }
  0x68   : > { %p2720_p11 = pneg %p2719_p10 }
  0x6a   : > { %p2725_p2 = pnand %p2724_p0, %p2720_p11 }
  0x6c   : > { %2728 = shalt.err (!%p2725_p2)
}
  0x6d   : > { %2273 = dma.hbm_to_vmem [thread:$0]  (!%p3095_p7), %s629_s19, 128, %s631_s15, %s619_s23  }
  0x6e   : > { %639 = sbr.rel (%p2978_p3) target bundleno = 3016 (0xbc8), region = 88 }
  0x73   : > { %2789 = dma.done.wait (%p83_p1), [#allocation5], 16  }
  0x74   : > { %2791 = vsyncadd (%p83_p1), [#allocation5], 4294967280  ;;  %s3135_s9 = sand.u32 1, %s2830_s25  }
  0x75   : > { %s3138_s11 = sshll.u32 %s3135_s9, 3  ;;  %s647_s22 = scalar_lea.sflag [#allocation3], %s3135_s9 }
  0x76   : > { %s650_s15 = scalar_lea.vmem [#allocation6], %s3138_s11 }
  0x77   : > { %2793 = dma.done.wait (%p3071_p12), %s647_s22, 128  }
  0x78   : > { %2795 = vsyncadd (%p3071_p12), %s647_s22, 4294967168  ;;  %s656_s18 = sand.u32 1, %s2973_s30   ;;  %s660_s12 = scalar_lea.vmem [#allocation7], %s3138_s11 }
  0x79   : > { %s657_s20 = scalar_lea.sflag [#allocation8], %s656_s18 }
  0x7a   : > { %2797 = dma.done.wait (%p3071_p12), %s657_s20, 128  }
  0x7b   : > { %2799 = vsyncadd (%p3071_p12), %s657_s20, 4294967168 }
  0x7c   : > { %2801 = dma.done.wait (%p83_p1), [#allocation8], 6144  }
  0x7d   : > { %2803 = vsyncadd (%p83_p1), [#allocation8], 4294961152 }
  0x7e   : > { %2805 = dma.done.wait (%p83_p1), [#allocation11], 2064  }
  0x7f   : > { %2807 = vsyncadd (%p83_p1), [#allocation11], 4294965232 }
  0x80   : > { %2809 = dma.done.wait (%p83_p1), [#allocation14], 2064  }
  0x81   : > { %2811 = vsyncadd (%p83_p1), [#allocation14], 4294965232 }
  0x82   : > { %2813 = dma.done.wait (%p83_p1), [#allocation17], 6144  }
  0x83   : > { %2815 = vsyncadd (%p83_p1), [#allocation17], 4294961152 }
  0x84   : > { %2817 = dma.done.wait (%p83_p1), [#allocation20], 8192  }
  0x85   : > { %2819 = vsyncadd (%p83_p1), [#allocation20], 4294959104 }
  0x86   : > { %711 = sfence }
  0x87   : > { %v811_v0 = vld [vmem:[#allocation9 + $0x170] sm:$0xff]  ;;  %v808_v1 = vld [vmem:[#allocation9 + $0x158] sm:$0xff]  ;;  %v810_v2 = vld [vmem:[#allocation9 + $0x168] sm:$0xff]  ;;  %vm905_vm0 = vcmask 261120   ;;  %s2856_s17 = smov 96   ;;  %s2857_s8 = smov 64  }
  0x88   : > { %841 = vmatpush.msra.mxu1 %v811_v0  ;;  %v805_v3 = vld [vmem:[#allocation9 + $0x140] sm:$0xff]  ;;  %821 = vmatpush.msra.mxu0 %v810_v2  ;;  %v807_v4 = vld [vmem:[#allocation9 + $0x150] sm:$0xff]  ;;  %v804_v5 = vld [vmem:[#allocation9 + $0x138] sm:$0xff]  ;;  %s2858_s19 = smov 32   ;;  %vm1002_vm1 = vcmask 64512   ;;  %vm1152_vm2 = vcmask 523264  }
  0x89   : > { %v802_v6 = vld [vmem:[#allocation9 + $0x128] sm:$0xff]  ;;  %v801_v7 = vld [vmem:[#allocation9 + $0x120] sm:$0xff]  ;;  %v799_v8 = vld [vmem:[#allocation9 + $0x110] sm:$0xff]  ;;  %vm1154_vm3 = vcmask 785408   ;;  %s1197_s28 = sld [smem:[#allocation2]]  ;;  %s762_s29 = scalar_lea.vmem [#allocation22], %s3138_s11 }
  0x8a   : > { %842 = vmatpush.msra.mxu1 %v808_v1  ;;  %822 = vmatpush.msra.mxu0 %v807_v4  ;;  %v798_v9 = vld [vmem:[#allocation9 + $0x108] sm:$0xff]  ;;  %v796_v10 = vld [vmem:[#allocation9 + $0xf8] sm:$0xff]  ;;  %v795_v11 = vld [vmem:[#allocation9 + $0xf0] sm:$0xff]  ;;  %s2169_s23 = sld [smem:[#allocation2 + $0x1]]  ;;  %s1933_s6 = sshll.u32 %s762_s29, 4  ;;  %s1934_s6 = int_to_ptr.vmem [resolvable:$true] %s1933_s6 }
  0x8b   : > { %v793_v12 = vld [vmem:[#allocation9 + $0xe0] sm:$0xff]  ;;  %v792_v13 = vld [vmem:[#allocation9 + $0xd8] sm:$0xff]  ;;  %v790_v14 = vld [vmem:[#allocation9 + $0xc8] sm:$0xff]  ;;  %s3397_s3 = sld [smem:[#allocation41_spill]] }
  0x8c   : > { %843 = vmatpush.msra.mxu1 %v805_v3  ;;  %823 = vmatpush.msra.mxu0 %v804_v5  ;;  %v789_v15 = vld [vmem:[#allocation9 + $0xc0] sm:$0xff]  ;;  %v787_v16 = vld [vmem:[#allocation9 + $0xb0] sm:$0xff]  ;;  %v786_v17 = vld [vmem:[#allocation9 + $0xa8] sm:$0xff]  ;;  %s3398_s13 = sld [smem:[#allocation43_spill]] }
  0x8d   : > { %v784_v18 = vld [vmem:[#allocation9 + $0x98] sm:$0xff]  ;;  %v783_v19 = vld [vmem:[#allocation9 + $0x90] sm:$0xff]  ;;  %v781_v20 = vld [vmem:[#allocation9 + $0x80] sm:$0xff]  ;;  %s3291_s22 = sld [smem:[#allocation2 + $0x2]] }
  0x8e   : > { %844 = vmatpush.msra.mxu1 %v802_v6  ;;  %824 = vmatpush.msra.mxu0 %v801_v7  ;;  %v780_v21 = vld [vmem:[#allocation9 + $0x78] sm:$0xff]  ;;  %v778_v22 = vld [vmem:[#allocation9 + $0x68] sm:$0xff]  ;;  %v777_v23 = vld [vmem:[#allocation9 + $0x60] sm:$0xff]  ;;  %s3401_s0 = sld [smem:[#allocation48_spill]] }
  0x8f   : > { %v775_v24 = vld [vmem:[#allocation9 + $0x50] sm:$0xff]  ;;  %v774_v25 = vld [vmem:[#allocation9 + $0x48] sm:$0xff]  ;;  %v772_v26 = vld [vmem:[#allocation9 + $0x38] sm:$0xff] }
  0x90   : > { %845 = vmatpush.msra.mxu1 %v799_v8  ;;  %825 = vmatpush.msra.mxu0 %v798_v9  ;;  %v771_v27 = vld [vmem:[#allocation9 + $0x30] sm:$0xff]  ;;  %v769_v28 = vld [vmem:[#allocation9 + $0x20] sm:$0xff]  ;;  %v768_v29 = vld [vmem:[#allocation9 + $0x18] sm:$0xff] }
  0x91   : > { %v766_v30 = vld [vmem:[#allocation9 + $0x8] sm:$0xff]  ;;  %v765_v32 = vld [vmem:[#allocation9] sm:$0xff]  ;;  %v812_v33 = vld [vmem:[#allocation9 + $0x178] sm:$0xff] }
  0x92   : > { %846 = vmatpush.msra.mxu1 %v796_v10  ;;  %826 = vmatpush.msra.mxu0 %v795_v11  ;;  %v3174_v31 = vld [vmem:[%s650_s15] sm:$0xff]  ;;  %v803_v36 = vld [vmem:[#allocation9 + $0x130] sm:$0xff]  ;;  %v800_v44 = vld [vmem:[#allocation9 + $0x118] sm:$0xff]  ;;  %s2183_s15 = sld [smem:[#allocation2 + $0x3]] }
  0x93   : > { %v809_v34 = vld [vmem:[#allocation9 + $0x160] sm:$0xff]  ;;  %861 = vmatpush.msra.mxu2 %v812_v33  ;;  %v806_v35 = vld [vmem:[#allocation9 + $0x148] sm:$0xff]  ;;  %v791_v47 = vld [vmem:[#allocation9 + $0xd0] sm:$0xff] }
  0x94   : > { %847 = vmatpush.msra.mxu1 %v793_v12  ;;  %827 = vmatpush.msra.mxu0 %v792_v13  ;;  %v813_v37 = vld [vmem:[%s3340_s4] sm:$0x7]  ;;  %v794_v46 = vld [vmem:[#allocation9 + $0xe8] sm:$0xff]  ;;  %v788_v48 = vld [vmem:[#allocation9 + $0xb8] sm:$0xff] }
  0x95   : > { %862 = vmatpush.msra.mxu2 %v809_v34  ;;  %v816_v38 = vperm.slane %v813_v37, 1  ;;  %v815_v39 = vperm.slane %v813_v37, 0  ;;  %v797_v45 = vld [vmem:[#allocation9 + $0x100] sm:$0xff]  ;;  %v782_v50 = vld [vmem:[#allocation9 + $0x88] sm:$0xff]  ;;  %v779_v51 = vld [vmem:[#allocation9 + $0x70] sm:$0xff]  ;;  %v817_v62 = vperm.slane %v813_v37, 2 }
  0x96   : > { %848 = vmatpush.msra.mxu1 %v790_v14  ;;  %828 = vmatpush.msra.mxu0 %v789_v15  ;;  %v785_v49 = vld [vmem:[#allocation9 + $0xa0] sm:$0xff]  ;;  %v776_v52 = vld [vmem:[#allocation9 + $0x58] sm:$0xff]  ;;  %v770_v54 = vld [vmem:[#allocation9 + $0x28] sm:$0xff] }
  0x97   : > { %863 = vmatpush.msra.mxu2 %v806_v35  ;;  %v773_v53 = vld [vmem:[#allocation9 + $0x40] sm:$0xff]  ;;  %v767_v55 = vld [vmem:[#allocation9 + $0x10] sm:$0xff] }
  0x98   : > { %849 = vmatpush.msra.mxu1 %v787_v16  ;;  %829 = vmatpush.msra.mxu0 %v786_v17 }
  0x99   : > { %864 = vmatpush.msra.mxu2 %v803_v36 }
  0x9a   : > { %850 = vmatpush.msra.mxu1 %v784_v18  ;;  %830 = vmatpush.msra.mxu0 %v783_v19 }
  0x9b   : > { %865 = vmatpush.msra.mxu2 %v800_v44 }
  0x9c   : > { %851 = vmatpush.msra.mxu1 %v781_v20  ;;  %831 = vmatpush.msra.mxu0 %v780_v21 }
  0x9d   : > { %866 = vmatpush.msra.mxu2 %v797_v45 }
  0x9e   : > { %852 = vmatpush.msra.mxu1 %v778_v22  ;;  %832 = vmatpush.msra.mxu0 %v777_v23 }
  0x9f   : > { %867 = vmatpush.msra.mxu2 %v794_v46 }
  0xa0   : > { %853 = vmatpush.msra.mxu1 %v775_v24  ;;  %833 = vmatpush.msra.mxu0 %v774_v25 }
  0xa1   : > { %868 = vmatpush.msra.mxu2 %v791_v47 }
  0xa2   : > { %854 = vmatpush.msra.mxu1 %v772_v26  ;;  %834 = vmatpush.msra.mxu0 %v771_v27 }
  0xa3   : > { %869 = vmatpush.msra.mxu2 %v788_v48  ;;  %v1171_v48 = vld [vmem:[#allocation10 + $0x78] sm:$0xff] }
  0xa4   : > { %855 = vmatpush.msra.mxu1 %v769_v28  ;;  %835 = vmatpush.msra.mxu0 %v768_v29 }
  0xa5   : > { %870 = vmatpush.msra.mxu2 %v785_v49  ;;  %v1170_v49 = vld [vmem:[#allocation10 + $0x70] sm:$0xff] }
  0xa6   : > { %856 = vmatpush.msra.mxu1 %v766_v30  ;;  %836 = vmatpush.msra.mxu0 %v765_v32 }
  0xa7   : > { %857 = vmatmul.f32.vlgmr.msra.gmra.mxu1 %v3174_v31  ;;  %837 = vmatmul.f32.vlgmr.msra.gmra.mxu0 %v3174_v31 }
  0xa8   : > { %871 = vmatpush.msra.mxu2 %v782_v50  ;;  %v1169_v50 = vld [vmem:[#allocation10 + $0x68] sm:$0xff] }
  0xaa   : > { %872 = vmatpush.msra.mxu2 %v779_v51  ;;  %v1168_v51 = vld [vmem:[#allocation10 + $0x60] sm:$0xff] }
  0xac   : > { %873 = vmatpush.msra.mxu2 %v776_v52  ;;  %v1167_v52 = vld [vmem:[#allocation10 + $0x58] sm:$0xff] }
  0xae   : > { %874 = vmatpush.msra.mxu2 %v773_v53  ;;  %v1166_v53 = vld [vmem:[#allocation10 + $0x50] sm:$0xff] }
  0xb0   : > { %875 = vmatpush.msra.mxu2 %v770_v54  ;;  %v1165_v54 = vld [vmem:[#allocation10 + $0x48] sm:$0xff] }
  0xb2   : > { %876 = vmatpush.msra.mxu2 %v767_v55  ;;  %v1164_v55 = vld [vmem:[#allocation10 + $0x40] sm:$0xff] }
  0xb3   : > { %877 = vmatmul.f32.vlgmr.msra.gmra.mxu2 %v3174_v31 }
 0x124   : > { %v858_v40 = vpop.f32.mrf.mxu1  ;;  %v838_v42 = vpop.f32.mrf.mxu0 }
 0x125   : > { %v859_v41 = vadd.f32 %v858_v40, %v816_v38  ;;  %v839_v43 = vadd.f32 %v838_v42, %v815_v39 }
 0x127   : > { %889 = vrot.lane.b32.xlu2 %v859_v41, %s2856_s17  ;;  %891 = vrot.lane.b32.xlu1 %v859_v41, %s2857_s8 }
 0x128   : > { %893 = vrot.lane.b32.xlu0 %v859_v41, %s2858_s19  ;;  %2157 = vmatpush.xpose.msk.msrb.mxu0 %vm905_vm0, %v859_v41 }
 0x12b   : > { %2158 = vmatmul.msk.f32.vlgmr.msrb.gmra.mxu0 %vm905_vm0, %v839_v43 }
 0x12f   : > { %882 = vrot.lane.b32.xlu2 %v839_v43, %s2856_s17  ;;  %884 = vrot.lane.b32.xlu1 %v839_v43, %s2857_s8 }
 0x130   : > { %886 = vrot.lane.b32.xlu0 %v839_v43, %s2858_s19 }
 0x136   : > { %v878_v63 = vpop.f32.mrf.mxu2 }
 0x137   : > { %v879_v0 = vadd.f32 %v878_v63, %v817_v62  ;;  %v1157_v62 = vld [vmem:[#allocation10 + $0x8] sm:$0xff]  ;;  %v1156_v63 = vld [vmem:[#allocation10] sm:$0xff] }
 0x181   : > { %v890_v56 = vpop.permute.xlu2 %889 }
 0x182   : > { %2159 = vmatpush.xpose.msk.msrb.mxu1 %vm905_vm0, %v890_v56  ;;  %v1163_v56 = vld [vmem:[#allocation10 + $0x38] sm:$0xff] }
 0x189   : > { %v883_v57 = vpop.permute.xlu2 %882 }
 0x18a   : > { %2160 = vmatmul.msk.f32.vlgmr.msrb.gmra.mxu1 %vm905_vm0, %v883_v57  ;;  %v1162_v57 = vld [vmem:[#allocation10 + $0x30] sm:$0xff] }
 0x199   : > { %v892_v58 = vpop.permute.xlu1 %891 }
 0x19a   : > { %v894_v59 = vpop.permute.xlu0 %893  ;;  %2161 = vmatpush.xpose.msk.msrb.mxu2 %vm905_vm0, %v892_v58  ;;  %v1161_v58 = vld [vmem:[#allocation10 + $0x28] sm:$0xff] }
 0x19b   : > { %2163 = vmatpush.xpose.msk.msra.mxu3 %vm905_vm0, %v894_v59  ;;  %v1160_v59 = vld [vmem:[#allocation10 + $0x20] sm:$0xff] }
 0x19f   : > { %1065 = vmatpush.msrb.mxu3 %v879_v0 }
 0x1a1   : > { %v885_v60 = vpop.permute.xlu1 %884 }
 0x1a2   : > { %v887_v61 = vpop.permute.xlu0 %886  ;;  %2162 = vmatmul.msk.f32.vlgmr.msrb.gmra.mxu2 %vm905_vm0, %v885_v60  ;;  %v1159_v60 = vld [vmem:[#allocation10 + $0x18] sm:$0xff] }
 0x1a3   : > { %2164 = vmatmul.msk.f32.vlgmr.msra.gmra.mxu3 %vm905_vm0, %v887_v61  ;;  %v1158_v61 = vld [vmem:[#allocation10 + $0x10] sm:$0xff] }
 0x1a4   : > { %1176 = vmatpush.msra.mxu3 %v1171_v48  ;;  %v1245_v48 = vld [vmem:[#allocation13 + $0x18] sm:$0xff] }
 0x1a6   : > { %1177 = vmatpush.msra.mxu3 %v1170_v49 }
 0x1a8   : > { %v927_v7 = vpop.f32.mrf.mxu0  ;;  %1178 = vmatpush.msra.mxu3 %v1169_v50  ;;  %v1244_v50 = vld [vmem:[#allocation13 + $0x10] sm:$0xff] }
 0x1a9   : > { %v1003_v8 = vsel %vm1002_vm1, %v927_v7, -inf }
 0x1aa   : > { %1179 = vmatpush.msra.mxu3 %v1168_v51 }
 0x1ac   : > { %1180 = vmatpush.msra.mxu3 %v1167_v52  ;;  %v1243_v52 = vld [vmem:[#allocation13 + $0x8] sm:$0xff] }
 0x1ae   : > { %1181 = vmatpush.msra.mxu3 %v1166_v53 }
 0x1b0   : > { %1182 = vmatpush.msra.mxu3 %v1165_v54  ;;  %v1242_v54 = vld [vmem:[#allocation13] sm:$0xff] }
 0x1b2   : > { %1183 = vmatpush.msra.mxu3 %v1164_v55 }
 0x1b4   : > { %1184 = vmatpush.msra.mxu3 %v1163_v56 }
 0x1b6   : > { %1185 = vmatpush.msra.mxu3 %v1162_v57 }
 0x1b8   : > { %1186 = vmatpush.msra.mxu3 %v1161_v58 }
 0x1ba   : > { %1187 = vmatpush.msra.mxu3 %v1160_v59 }
 0x1bc   : > { %1188 = vmatpush.msra.mxu3 %v1159_v60 }
 0x1be   : > { %1189 = vmatpush.msra.mxu3 %v1158_v61 }
 0x1c0   : > { %1190 = vmatpush.msra.mxu3 %v1157_v62 }
 0x1c2   : > { %1191 = vmatpush.msra.mxu3 %v1156_v63 }
 0x207   : > { %v951_v1 = vpop.f32.mrf.mxu1 }
 0x208   : > { %v1006_v2 = vsel %vm1002_vm1, %v951_v1, -inf }
 0x209   : > { %1007 = vmax.xlane.f32.xlu1 %v1006_v2 }
 0x225   : > { %v975_v3 = vpop.f32.mrf.mxu2 }
 0x226   : > { %v999_v4 = vpop.f32.mrf.mxu3  ;;  %v1009_v5 = vsel %vm1002_vm1, %v975_v3, -inf }
 0x227   : > { %1010 = vmax.xlane.f32.xlu2 %v1009_v5  ;;  %v1012_v6 = vsel %vm1002_vm1, %v999_v4, -inf }
 0x228   : > { %1013 = vmax.xlane.f32.xlu0 %v1012_v6 }
 0x22f   : > { %1004 = vmax.xlane.f32.xlu2 %v1003_v8  ;;  %v2351_v8 = vld [vmem:[#allocation12] ss:$0 sm:$0xff] }
 0x27c   : > { %v1008_v9 = vpop.xlane.xlu1 %1007 }
 0x27d   : > { %v1016_v10 = vsub.f32 %v951_v1, %v1008_v9 }
 0x27f   : > { %v1021_v11 = vmul.f32 1.442695, %v1016_v10 }
 0x281   : > { %2355 = vpow2.f32 %v1021_v11 }
 0x287   : > { %v2356_v12 = vpop.eup %2355 }
 0x288   : > { %v1030_v13 = vsel %vm1002_vm1, %v2356_v12, 0.0 }
 0x289   : > { %1031 = vadd.xlane.f32.xlu1 %v1030_v13  ;;  %v1310_v13 = vld [vmem:[#allocation16 + $0xe0] sm:$0xff] }
 0x29a   : > { %v1011_v14 = vpop.xlane.xlu2 %1010 }
 0x29b   : > { %v1017_v15 = vsub.f32 %v975_v3, %v1011_v14  ;;  %v1014_v16 = vpop.xlane.xlu0 %1013  ;;  %v1308_v14 = vld [vmem:[#allocation16 + $0xd0] sm:$0xff] }
 0x29c   : > { %v1018_v17 = vsub.f32 %v999_v4, %v1014_v16  ;;  %v1304_v16 = vld [vmem:[#allocation16 + $0xb0] sm:$0xff] }
 0x29d   : > { %v1023_v18 = vmul.f32 1.442695, %v1017_v15  ;;  %v1306_v15 = vld [vmem:[#allocation16 + $0xc0] sm:$0xff] }
 0x29e   : > { %v1025_v19 = vmul.f32 1.442695, %v1018_v17  ;;  %v1302_v17 = vld [vmem:[#allocation16 + $0xa0] sm:$0xff] }
 0x29f   : > { %2357 = vpow2.f32 %v1023_v18  ;;  %v1300_v18 = vld [vmem:[#allocation16 + $0x90] sm:$0xff] }
 0x2a0   : > { %2359 = vpow2.f32 %v1025_v19  ;;  %v1296_v19 = vld [vmem:[#allocation16 + $0x70] sm:$0xff] }
 0x2a2   : > { %896 = vrot.lane.b32.xlu1 %v879_v0, %s2856_s17  ;;  %v1005_v24 = vpop.xlane.xlu2 %1004 }
 0x2a3   : > { %v1015_v25 = vsub.f32 %v927_v7, %v1005_v24  ;;  %v1312_v7 = vld [vmem:[#allocation16 + $0xf0] sm:$0xff]  ;;  %v1286_v24 = vld [vmem:[#allocation16 + $0x20] sm:$0xff] }
 0x2a5   : > { %v2358_v20 = vpop.eup %2357  ;;  %v1019_v26 = vmul.f32 1.442695, %v1015_v25  ;;  %v1257_v25 = vld [vmem:[#allocation13 + $0x78] sm:$0xff] }
 0x2a6   : > { %v2360_v21 = vpop.eup %2359  ;;  %v1033_v22 = vsel %vm1002_vm1, %v2358_v20, 0.0 }
 0x2a7   : > { %v1036_v23 = vsel %vm1002_vm1, %v2360_v21, 0.0  ;;  %1034 = vadd.xlane.f32.xlu2 %v1033_v22  ;;  %2361 = vpow2.f32 %v1019_v26  ;;  %v1290_v22 = vld [vmem:[#allocation16 + $0x40] sm:$0xff]  ;;  %v1284_v26 = vld [vmem:[#allocation16 + $0x10] sm:$0xff] }
 0x2a8   : > { %1037 = vadd.xlane.f32.xlu0 %v1036_v23  ;;  %v1288_v23 = vld [vmem:[#allocation16 + $0x30] sm:$0xff] }
 0x2ad   : > { %v2362_v27 = vpop.eup %2361 }
 0x2ae   : > { %v1027_v28 = vsel %vm1002_vm1, %v2362_v27, 0.0 }
 0x2bc   : > { %902 = vrot.lane.b32.xlu0 %v879_v0, %s2858_s19 }
 0x2bf   : > { %899 = vrot.lane.b32.xlu2 %v879_v0, %s2857_s8 }
 0x2e6   : > { %1028 = vadd.xlane.f32.xlu0 %v1027_v28  ;;  %v1282_v28 = vld [vmem:[#allocation16] sm:$0xff] }
 0x2fc   : > { %v1032_v29 = vpop.xlane.xlu1 %1031 }
 0x2fd   : > { %2363 = vrcp.f32 %v1032_v29  ;;  %v1255_v29 = vld [vmem:[#allocation13 + $0x68] sm:$0xff] }
 0x303   : > { %v2364_v30 = vpop.eup %2363 }
 0x304   : > { %v1044_v32 = vmul.f32 %v2364_v30, %v2356_v12  ;;  %v3225_v30 = vld [vmem:[%s660_s12] sm:$0xff]  ;;  %s3399_s12 = sld [smem:[#allocation45_spill]] }
 0x314   : > { %v897_v33 = vpop.permute.xlu1 %896 }
 0x315   : > { %1088 = vmatpush.msra.mxu0 %v897_v33  ;;  %v1253_v33 = vld [vmem:[#allocation13 + $0x58] sm:$0xff] }
 0x316   : > { %2166 = vmatmul.msk.f32.vlgmr.msra.gmra.mxu0 %vm1002_vm1, %v1044_v32  ;;  %v1254_v32 = vld [vmem:[#allocation13 + $0x60] sm:$0xff] }
 0x317   : > { %1262 = vmatpush.msrb.mxu0 %v1257_v25  ;;  %v1299_v25 = vld [vmem:[#allocation16 + $0x88] sm:$0xff] }
 0x31a   : > { %v1035_v34 = vpop.xlane.xlu2 %1034 }
 0x31b   : > { %2365 = vrcp.f32 %v1035_v34  ;;  %v1038_v36 = vpop.xlane.xlu0 %1037 }
 0x31c   : > { %2367 = vrcp.f32 %v1038_v36  ;;  %v1252_v36 = vld [vmem:[#allocation13 + $0x50] sm:$0xff] }
 0x321   : > { %v2366_v35 = vpop.eup %2365 }
 0x322   : > { %v1045_v37 = vmul.f32 %v2366_v35, %v2358_v20  ;;  %v900_v38 = vpop.permute.xlu2 %899  ;;  %v2368_v39 = vpop.eup %2367  ;;  %v1294_v20 = vld [vmem:[#allocation16 + $0x60] sm:$0xff] }
 0x323   : > { %1111 = vmatpush.msra.mxu1 %v900_v38  ;;  %v1046_v40 = vmul.f32 %v2368_v39, %v2360_v21  ;;  %v1292_v21 = vld [vmem:[#allocation16 + $0x50] sm:$0xff]  ;;  %v1251_v38 = vld [vmem:[#allocation13 + $0x48] sm:$0xff] }
 0x324   : > { %2167 = vmatmul.msk.f32.vlgmr.msra.gmra.mxu1 %vm1002_vm1, %v1045_v37 }
 0x325   : > { %1320 = vmatpush.msrb.mxu1 %v1312_v7  ;;  %v1236_v7 = vstv %s1197_s28  ;;  %s2187_s28 = sshll.u32 %s2973_s30, 3 }
 0x327   : > { %1321 = vmatpush.msrb.mxu1 %v1310_v13  ;;  %v1240_v13 = vstv %s2169_s23 }
 0x329   : > { %1322 = vmatpush.msrb.mxu1 %v1308_v14 }
 0x32b   : > { %1323 = vmatpush.msrb.mxu1 %v1306_v15 }
 0x32d   : > { %1324 = vmatpush.msrb.mxu1 %v1304_v16  ;;  %v3239_v16 = vld [vmem:[%s3397_s3] sm:$0x3]  ;;  %s1931_s3 = scalar_lea.hbm %s3401_s0, %s2187_s28 }
 0x32e   : > { %v903_v41 = vpop.permute.xlu0 %902  ;;  %s1935_s30 = sshll.u32 %s1931_s3, 4  ;;  %s1936_s30 = int_to_ptr.hbm [resolvable:$true] %s1935_s30 }
 0x32f   : > { %1134 = vmatpush.msra.mxu2 %v903_v41  ;;  %1325 = vmatpush.msrb.mxu1 %v1302_v17  ;;  %v1250_v41 = vld [vmem:[#allocation13 + $0x40] sm:$0xff]  ;;  %v1316_v17 = vperm.slane %v3239_v16, 0 }
 0x330   : > { %2168 = vmatmul.msk.f32.vlgmr.msra.gmra.mxu2 %vm1002_vm1, %v1046_v40 }
 0x331   : > { %1326 = vmatpush.msrb.mxu1 %v1300_v18 }
 0x359   : > { %v1029_v42 = vpop.xlane.xlu0 %1028 }
 0x35a   : > { %2369 = vrcp.f32 %v1029_v42 }
 0x360   : > { %v2370_v43 = vpop.eup %2369 }
 0x361   : > { %v1043_v44 = vmul.f32 %v2370_v43, %v2362_v27  ;;  %v1256_v27 = vld [vmem:[#allocation13 + $0x70] sm:$0xff]  ;;  %v1249_v43 = vld [vmem:[#allocation13 + $0x38] sm:$0xff] }
 0x362   : > { %1263 = vmatpush.msrb.mxu0 %v1256_v27  ;;  %v1295_v27 = vld [vmem:[#allocation16 + $0x68] sm:$0xff] }
 0x363   : > { %2165 = vmatmul.msk.f32.vlgmr.msrb.gmra.mxu3 %vm1002_vm1, %v1043_v44 }
 0x364   : > { %1264 = vmatpush.msrb.mxu0 %v1255_v29  ;;  %v1293_v29 = vld [vmem:[#allocation16 + $0x58] sm:$0xff] }
 0x366   : > { %1265 = vmatpush.msrb.mxu0 %v1254_v32  ;;  %v1291_v32 = vld [vmem:[#allocation16 + $0x48] sm:$0xff] }
 0x368   : > { %1266 = vmatpush.msrb.mxu0 %v1253_v33 }
 0x36a   : > { %1267 = vmatpush.msrb.mxu0 %v1252_v36  ;;  %v1287_v36 = vld [vmem:[#allocation16 + $0x28] sm:$0xff] }
 0x36c   : > { %1268 = vmatpush.msrb.mxu0 %v1251_v38  ;;  %v1283_v38 = vld [vmem:[#allocation16 + $0x8] sm:$0xff] }
 0x36e   : > { %1269 = vmatpush.msrb.mxu0 %v1250_v41 }
 0x370   : > { %1270 = vmatpush.msrb.mxu0 %v1249_v43 }
 0x393   : > { %v1090_v45 = vpop.f32.mrf.mxu0 }
 0x394   : > { %1140 = vrot.lane.b32.xlu1 %v1090_v45, %s2858_s19  ;;  %v1248_v45 = vld [vmem:[#allocation13 + $0x30] sm:$0xff] }
 0x395   : > { %1271 = vmatpush.msrb.mxu0 %v1248_v45 }
 0x3a1   : > { %v1113_v46 = vpop.f32.mrf.mxu1 }
 0x3a2   : > { %1144 = vrot.lane.b32.xlu2 %v1113_v46, %s2857_s8  ;;  %v1247_v46 = vld [vmem:[#allocation13 + $0x28] sm:$0xff] }
 0x3a3   : > { %1272 = vmatpush.msrb.mxu0 %v1247_v46 }
 0x3b3   : > { %v1136_v47 = vpop.f32.mrf.mxu2 }
 0x3b4   : > { %1148 = vrot.lane.b32.xlu1 %v1136_v47, %s2856_s17  ;;  %v1246_v47 = vld [vmem:[#allocation13 + $0x20] sm:$0xff] }
 0x3b5   : > { %1273 = vmatpush.msrb.mxu0 %v1246_v47 }
 0x3b7   : > { %1274 = vmatpush.msrb.mxu0 %v1245_v48 }
 0x3b9   : > { %1275 = vmatpush.msrb.mxu0 %v1244_v50 }
 0x3bb   : > { %1276 = vmatpush.msrb.mxu0 %v1243_v52 }
 0x3bd   : > { %1277 = vmatpush.msrb.mxu0 %v1242_v54 }
 0x3e6   : > { %v1067_v1 = vpop.f32.mrf.mxu3 }
 0x3fc   : > { %v1145_v3 = vpop.permute.xlu2 %1144 }
 0x406   : > { %v1141_v0 = vpop.permute.xlu1 %1140 }
 0x407   : > { %v1151_v2 = vsel %vm905_vm0, %v1067_v1, %v1141_v0 }
 0x408   : > { %v1153_v5 = vsel %vm1152_vm2, %v1151_v2, %v1145_v3 }
 0x426   : > { %v1149_v4 = vpop.permute.xlu1 %1148 }
 0x427   : > { %v1155_v6 = vsel %vm1154_vm3, %v1153_v5, %v1149_v4 }
 0x428   : > { %1192 = vmatmul.f32.vlgmr.msra.gmra.mxu3 %v1155_v6 }
 0x4ab   : > { %v1193_v9 = vpop.f32.mrf.mxu3 }
 0x4ac   : > { %v1194_v10 = vadd.f32 %v2351_v8, %v1193_v9 }
 0x4ae   : > { %v3218_v11 = vadd.f32 %v1194_v10, %v3174_v31  ;;  %v1298_v31 = vld [vmem:[#allocation16 + $0x80] sm:$0xff] }
 0x4af   : > { %1327 = vmatpush.msrb.mxu1 %v1298_v31 }
 0x4b0   : > { %1199 = vadd.xlane.f32.xlu2 %v3218_v11  ;;  %v1201_v12 = vmul.f32 %v3218_v11, %v3218_v11 }
 0x4b1   : > { %1328 = vmatpush.msrb.mxu1 %v1296_v19  ;;  %v1311_v19 = vld [vmem:[#allocation16 + $0xe8] sm:$0xff] }
 0x4b2   : > { %1202 = vadd.xlane.f32.xlu1 %v1201_v12 }
 0x4b3   : > { %1329 = vmatpush.msrb.mxu1 %v1294_v20  ;;  %v1309_v20 = vld [vmem:[#allocation16 + $0xd8] sm:$0xff] }
 0x4b5   : > { %1330 = vmatpush.msrb.mxu1 %v1292_v21  ;;  %v1307_v21 = vld [vmem:[#allocation16 + $0xc8] sm:$0xff] }
 0x4b7   : > { %1331 = vmatpush.msrb.mxu1 %v1290_v22  ;;  %v1305_v22 = vld [vmem:[#allocation16 + $0xb8] sm:$0xff] }
 0x4b9   : > { %1332 = vmatpush.msrb.mxu1 %v1288_v23  ;;  %v1303_v23 = vld [vmem:[#allocation16 + $0xa8] sm:$0xff] }
 0x4bb   : > { %1333 = vmatpush.msrb.mxu1 %v1286_v24  ;;  %v1301_v24 = vld [vmem:[#allocation16 + $0x98] sm:$0xff] }
 0x4bd   : > { %1334 = vmatpush.msrb.mxu1 %v1284_v26  ;;  %v1297_v26 = vld [vmem:[#allocation16 + $0x78] sm:$0xff] }
 0x4bf   : > { %1335 = vmatpush.msrb.mxu1 %v1282_v28  ;;  %v2352_v28 = vld [vmem:[#allocation15] ss:$0 sm:$0xff] }
 0x4c0   : > { %1336 = vmatmul.f32.vlgmr.msrb.gmra.mxu1 %v3225_v30 }
 0x523   : > { %v1200_v34 = vpop.xlane.xlu2 %1199 }
 0x524   : > { %v3228_v35 = vmul.f32 0.0078125, %v1200_v34 }
 0x525   : > { %v1203_v39 = vpop.xlane.xlu1 %1202 }
 0x526   : > { %v1205_v37 = vmul.f32 %v3228_v35, %v1200_v34  ;;  %v1238_v10 = vsub.f32 %v3218_v11, %v3228_v35  ;;  %v1313_v11 = vld [vmem:[#allocation16 + $0xf8] sm:$0xff] }
 0x527   : > { %1340 = vmatpush.msrb.mxu2 %v1313_v11  ;;  %v1289_v35 = vld [vmem:[#allocation16 + $0x38] sm:$0xff] }
 0x528   : > { %v1206_v40 = vsub.f32 %v1203_v39, %v1205_v37  ;;  %v1285_v37 = vld [vmem:[#allocation16 + $0x18] sm:$0xff] }
 0x529   : > { %1341 = vmatpush.msrb.mxu2 %v1311_v19 }
 0x52a   : > { %v1207_v42 = vmax.f32 %v1206_v40, 0.0 }
 0x52b   : > { %1342 = vmatpush.msrb.mxu2 %v1309_v20 }
 0x52c   : > { %v1208_v44 = vmul.f32 0.007874016, %v1207_v42 }
 0x52d   : > { %1343 = vmatpush.msrb.mxu2 %v1307_v21 }
 0x52e   : > { %2371 = vrsqrt.f32 %v1208_v44  ;;  %vm1216_vm4 = vcmp.eq.f32.partialorder %v1208_v44, inf  ;;  %v1219_v59 = vand.u32 2147483648, %v1208_v44  ;;  %vm1218_vm5 = vcmp.eq.f32.partialorder %v1208_v44, 0.0 }
 0x52f   : > { %1344 = vmatpush.msrb.mxu2 %v1305_v22 }
 0x531   : > { %1345 = vmatpush.msrb.mxu2 %v1303_v23 }
 0x533   : > { %1346 = vmatpush.msrb.mxu2 %v1301_v24 }
 0x534   : > { %v2372_v49 = vpop.eup %2371 }
 0x535   : > { %v1210_v51 = vmul.f32 %v2372_v49, %v1208_v44  ;;  %1347 = vmatpush.msrb.mxu2 %v1299_v25 }
 0x537   : > { %v1211_v53 = vmul.f32 %v2372_v49, %v1210_v51  ;;  %1348 = vmatpush.msrb.mxu2 %v1297_v26 }
 0x539   : > { %v1212_v55 = vmul.f32 0.5, %v1211_v53  ;;  %1349 = vmatpush.msrb.mxu2 %v1295_v27 }
 0x53b   : > { %v1213_v56 = vsub.f32 1.5, %v1212_v55  ;;  %1350 = vmatpush.msrb.mxu2 %v1293_v29  ;;  %v1646_v29 = vld [vmem:[#allocation18 + $0x78] sm:$0xff] }
 0x53d   : > { %v1214_v57 = vmul.f32 %v2372_v49, %v1213_v56  ;;  %v1337_v18 = vpop.f32.mrf.mxu1  ;;  %1351 = vmatpush.msrb.mxu2 %v1291_v32  ;;  %v1645_v32 = vld [vmem:[#allocation18 + $0x70] sm:$0xff] }
 0x53e   : > { %v1338_v31 = vadd.f32 %v1337_v18, %v1316_v17 }
 0x53f   : > { %v1215_v58 = vmul.f32 %v1214_v57, %v1208_v44  ;;  %1352 = vmatpush.msrb.mxu2 %v1289_v35  ;;  %v1642_v35 = vld [vmem:[#allocation18 + $0x58] sm:$0xff] }
 0x540   : > { %1372 = vrot.lane.b32.xlu0 %v1338_v31, %s2858_s19  ;;  %1370 = vrot.lane.b32.xlu1 %v1338_v31, %s2857_s8 }
 0x541   : > { %v1217_v60 = vsel %vm1216_vm4, %v1208_v44, %v1215_v58  ;;  %2170 = vmatpush.xpose.msk.msrb.mxu3 %vm905_vm0, %v1338_v31  ;;  %1353 = vmatpush.msrb.mxu2 %v1287_v36  ;;  %v1641_v36 = vld [vmem:[#allocation18 + $0x50] sm:$0xff] }
 0x542   : > { %v1220_v61 = vsel %vm1218_vm5, %v1219_v59, %v1217_v60 }
 0x543   : > { %v1221_v62 = vadd.f32 1e-05, %v1220_v61  ;;  %1354 = vmatpush.msrb.mxu2 %v1285_v37  ;;  %v1640_v37 = vld [vmem:[#allocation18 + $0x48] sm:$0xff] }
 0x545   : > { %2373 = vrcp.f32 %v1221_v62  ;;  %v1233_v2 = vand.u32 2147483648, %v1221_v62  ;;  %v1231_v4 = vand.u32 2147483647, %v1221_v62  ;;  %vm1227_vm7 = vweird.f32 %v1221_v62  ;;  %1355 = vmatpush.msrb.mxu2 %v1283_v38  ;;  %v1639_v38 = vld [vmem:[#allocation18 + $0x40] sm:$0xff] }
 0x546   : > { %1356 = vmatmul.f32.vlgmr.msrb.gmra.mxu2 %v3225_v30  ;;  %v1317_v30 = vperm.slane %v3239_v16, 1 }
 0x547   : > { %v1234_v6 = vor.u32 1.1754944e-38, %v1233_v2  ;;  %vm1232_vm9 = vcmp.eq.f32.partialorder %v1231_v4, 8.507059e+37 }
 0x548   : > { %1368 = vrot.lane.b32.xlu0 %v1338_v31, %s2856_s17 }
 0x54b   : > { %v2374_v63 = vpop.eup %2373 }
 0x54c   : > { %v1223_v0 = vmul.f32 %v2374_v63, %v1221_v62  ;;  %vm1228_vm6 = vweird.f32 %v2374_v63 }
 0x54d   : > { %vm1229_vm8 = vmor %vm1227_vm7, %vm1228_vm6 }
 0x54e   : > { %v1224_v1 = vsub.f32 1.0, %v1223_v0 }
 0x550   : > { %v1225_v3 = vmul.f32 %v2374_v63, %v1224_v1 }
 0x552   : > { %v1226_v5 = vadd.f32 %v2374_v63, %v1225_v3 }
 0x554   : > { %v1230_v8 = vsel %vm1229_vm8, %v2374_v63, %v1226_v5 }
 0x555   : > { %v1235_v9 = vsel %vm1232_vm9, %v1234_v6, %v1230_v8 }
 0x556   : > { %v1237_v12 = vmul.f32 %v1236_v7, %v1235_v9 }
 0x558   : > { %v1239_v14 = vmul.f32 %v1238_v10, %v1237_v12 }
 0x55a   : > { %v3233_v15 = vadd.f32 %v1240_v13, %v1239_v14 }
 0x55c   : > { %1278 = vmatmul.f32.vlgmr.msrb.gmra.mxu0 %v3233_v15 }
 0x5b2   : > { %v1373_v39 = vpop.permute.xlu0 %1372  ;;  %v1371_v40 = vpop.permute.xlu1 %1370 }
 0x5b3   : > { %2176 = vmatpush.xpose.msk.msra.mxu2 %vm905_vm0, %v1373_v39  ;;  %2174 = vmatpush.xpose.msk.msra.mxu1 %vm905_vm0, %v1371_v40  ;;  %v1638_v39 = vld [vmem:[#allocation18 + $0x38] sm:$0xff]  ;;  %v1637_v40 = vld [vmem:[#allocation18 + $0x30] sm:$0xff] }
 0x5ba   : > { %v1369_v41 = vpop.permute.xlu0 %1368 }
 0x5bb   : > { %2172 = vmatpush.xpose.msk.msra.mxu0 %vm905_vm0, %v1369_v41  ;;  %v1636_v41 = vld [vmem:[#allocation18 + $0x28] sm:$0xff] }
 0x5c9   : > { %v1357_v45 = vpop.f32.mrf.mxu2 }
 0x5ca   : > { %v1358_v46 = vadd.f32 %v1357_v45, %v1317_v30  ;;  %v1632_v30 = vld [vmem:[#allocation18 + $0x8] sm:$0xff]  ;;  %v1631_v45 = vld [vmem:[#allocation18] sm:$0xff] }
 0x5cc   : > { %1542 = vmatpush.msra.mxu3 %v1358_v46 }
 0x5d9   : > { %v1279_v33 = vpop.f32.mrf.mxu0 }
 0x5da   : > { %v1280_v34 = vadd.f32 %v2352_v28, %v1279_v33  ;;  %v1644_v33 = vld [vmem:[#allocation18 + $0x68] sm:$0xff] }
 0x5dc   : > { %1365 = vrot.lane.b32.xlu2 %v1280_v34, %s2858_s19  ;;  %1361 = vrot.lane.b32.xlu0 %v1280_v34, %s2856_s17 }
 0x5dd   : > { %2171 = vmatmul.msk.f32.vlgmr.msrb.gmra.mxu3 %vm905_vm0, %v1280_v34 }
 0x5de   : > { %1651 = vmatpush.msrb.mxu3 %v1646_v29  ;;  %v1722_v29 = vld [vmem:[#allocation19 + $0x28] sm:$0xff] }
 0x5e0   : > { %1652 = vmatpush.msrb.mxu3 %v1645_v32 }
 0x5e2   : > { %1653 = vmatpush.msrb.mxu3 %v1644_v33  ;;  %v1719_v33 = vld [vmem:[#allocation19 + $0x10] sm:$0xff] }
 0x5e4   : > { %1363 = vrot.lane.b32.xlu0 %v1280_v34, %s2857_s8  ;;  %v1643_v34 = vld [vmem:[#allocation18 + $0x60] sm:$0xff] }
 0x5e5   : > { %1654 = vmatpush.msrb.mxu3 %v1643_v34  ;;  %v1720_v34 = vld [vmem:[#allocation19 + $0x18] sm:$0xff] }
 0x5e7   : > { %1655 = vmatpush.msrb.mxu3 %v1642_v35 }
 0x5e9   : > { %1656 = vmatpush.msrb.mxu3 %v1641_v36  ;;  %v1717_v36 = vld [vmem:[#allocation19] sm:$0xff] }
 0x5eb   : > { %1657 = vmatpush.msrb.mxu3 %v1640_v37  ;;  %v1718_v37 = vld [vmem:[#allocation19 + $0x8] sm:$0xff] }
 0x5ed   : > { %1658 = vmatpush.msrb.mxu3 %v1639_v38 }
 0x5ef   : > { %1659 = vmatpush.msrb.mxu3 %v1638_v39  ;;  %v1812_v39 = vld [vmem:[#allocation21 + $0x78] sm:$0xff] }
 0x5f1   : > { %1660 = vmatpush.msrb.mxu3 %v1637_v40  ;;  %v1828_v40 = vld [vmem:[#allocation21 + $0xf8] sm:$0xff] }
 0x5f3   : > { %1661 = vmatpush.msrb.mxu3 %v1636_v41  ;;  %v1811_v41 = vld [vmem:[#allocation21 + $0x70] sm:$0xff] }
 0x636   : > { %v1366_v42 = vpop.permute.xlu2 %1365 }
 0x637   : > { %2177 = vmatmul.msk.f32.vlgmr.msra.gmra.mxu2 %vm905_vm0, %v1366_v42  ;;  %v1635_v42 = vld [vmem:[#allocation18 + $0x20] sm:$0xff] }
 0x638   : > { %1662 = vmatpush.msrb.mxu3 %v1635_v42 }
 0x64e   : > { %v1362_v43 = vpop.permute.xlu0 %1361 }
 0x64f   : > { %2173 = vmatmul.msk.f32.vlgmr.msra.gmra.mxu0 %vm905_vm0, %v1362_v43  ;;  %v1634_v43 = vld [vmem:[#allocation18 + $0x18] sm:$0xff] }
 0x650   : > { %1663 = vmatpush.msrb.mxu3 %v1634_v43  ;;  %v1827_v43 = vld [vmem:[#allocation21 + $0xf0] sm:$0xff] }
 0x656   : > { %v1364_v44 = vpop.permute.xlu0 %1363 }
 0x657   : > { %2175 = vmatmul.msk.f32.vlgmr.msra.gmra.mxu1 %vm905_vm0, %v1364_v44  ;;  %v1633_v44 = vld [vmem:[#allocation18 + $0x10] sm:$0xff] }
 0x658   : > { %1664 = vmatpush.msrb.mxu3 %v1633_v44  ;;  %v1810_v44 = vld [vmem:[#allocation21 + $0x68] sm:$0xff] }
 0x65a   : > { %1665 = vmatpush.msrb.mxu3 %v1632_v30  ;;  %v1826_v30 = vld [vmem:[#allocation21 + $0xe8] sm:$0xff] }
 0x65c   : > { %1666 = vmatpush.msrb.mxu3 %v1631_v45 }
 0x660   : > { %v1405_v49 = vpop.f32.mrf.mxu3 }
 0x661   : > { %v1480_v50 = vsel %vm1002_vm1, %v1405_v49, -inf }
 0x6ba   : > { %v1477_v47 = vpop.f32.mrf.mxu2 }
 0x6bb   : > { %v1489_v48 = vsel %vm1002_vm1, %v1477_v47, -inf }
 0x6bc   : > { %1490 = vmax.xlane.f32.xlu2 %v1489_v48 }
 0x6c4   : > { %1481 = vmax.xlane.f32.xlu2 %v1480_v50 }
 0x6cc   : > { %v1429_v51 = vpop.f32.mrf.mxu0 }
 0x6cd   : > { %v1483_v52 = vsel %vm1002_vm1, %v1429_v51, -inf }
 0x6ce   : > { %1484 = vmax.xlane.f32.xlu0 %v1483_v52 }
 0x6d4   : > { %v1453_v53 = vpop.f32.mrf.mxu1 }
 0x6d5   : > { %v1486_v54 = vsel %vm1002_vm1, %v1453_v53, -inf }
 0x6d6   : > { %1487 = vmax.xlane.f32.xlu1 %v1486_v54 }
 0x72f   : > { %v1491_v55 = vpop.xlane.xlu2 %1490 }
 0x730   : > { %v1495_v56 = vsub.f32 %v1477_v47, %v1491_v55 }
 0x732   : > { %v1502_v57 = vmul.f32 1.442695, %v1495_v56 }
 0x734   : > { %2375 = vpow2.f32 %v1502_v57 }
 0x737   : > { %v1482_v6 = vpop.xlane.xlu2 %1481 }
 0x738   : > { %v1492_v7 = vsub.f32 %v1405_v49, %v1482_v6  ;;  %v1738_v6 = vld [vmem:[#allocation19 + $0xa8] sm:$0xff] }
 0x73a   : > { %v2376_v58 = vpop.eup %2375  ;;  %v1496_v8 = vmul.f32 1.442695, %v1492_v7 }
 0x73b   : > { %v1513_v59 = vsel %vm1002_vm1, %v2376_v58, 0.0 }
 0x73c   : > { %1514 = vadd.xlane.f32.xlu0 %v1513_v59  ;;  %v1748_v59 = vld [vmem:[#allocation19 + $0xf8] sm:$0xff] }
 0x741   : > { %v1485_v60 = vpop.xlane.xlu0 %1484 }
 0x742   : > { %v1493_v61 = vsub.f32 %v1429_v51, %v1485_v60  ;;  %v1745_v60 = vld [vmem:[#allocation19 + $0xe0] sm:$0xff] }
 0x744   : > { %v1498_v62 = vmul.f32 1.442695, %v1493_v61  ;;  %v1746_v61 = vld [vmem:[#allocation19 + $0xe8] sm:$0xff] }
 0x746   : > { %2377 = vpow2.f32 %v1498_v62  ;;  %v1743_v62 = vld [vmem:[#allocation19 + $0xd0] sm:$0xff] }
 0x749   : > { %v1488_v63 = vpop.xlane.xlu1 %1487 }
 0x74a   : > { %v1494_v0 = vsub.f32 %v1453_v53, %v1488_v63  ;;  %v2353_v53 = vld [vmem:[%s3398_s13] ss:$0 sm:$0xff]  ;;  %s1921_s13 = scalar_lea.sflag [#allocation4], %s3135_s9 }
 0x74b   : > { %v1744_v63 = vld [vmem:[#allocation19 + $0xd8] sm:$0xff] }
 0x74c   : > { %v2378_v1 = vpop.eup %2377  ;;  %v1500_v2 = vmul.f32 1.442695, %v1494_v0  ;;  %v1741_v0 = vld [vmem:[#allocation19 + $0xc0] sm:$0xff] }
 0x74d   : > { %v1507_v3 = vsel %vm1002_vm1, %v2378_v1, 0.0 }
 0x74e   : > { %2379 = vpow2.f32 %v1500_v2  ;;  %1508 = vadd.xlane.f32.xlu1 %v1507_v3  ;;  %v1739_v2 = vld [vmem:[#allocation19 + $0xb0] sm:$0xff]  ;;  %v1740_v3 = vld [vmem:[#allocation19 + $0xb8] sm:$0xff] }
 0x74f   : > { %2381 = vpow2.f32 %v1496_v8 }
 0x750   : > { %1381 = vrot.lane.b32.xlu0 %v1358_v46, %s2858_s19 }
 0x754   : > { %v2380_v4 = vpop.eup %2379 }
 0x755   : > { %v1510_v5 = vsel %vm1002_vm1, %v2380_v4, 0.0  ;;  %v2382_v9 = vpop.eup %2381 }
 0x756   : > { %1511 = vadd.xlane.f32.xlu2 %v1510_v5  ;;  %v1504_v10 = vsel %vm1002_vm1, %v2382_v9, 0.0  ;;  %v1737_v5 = vld [vmem:[#allocation19 + $0xa0] sm:$0xff] }
 0x767   : > { %1375 = vrot.lane.b32.xlu1 %v1358_v46, %s2856_s17 }
 0x76e   : > { %1378 = vrot.lane.b32.xlu2 %v1358_v46, %s2857_s8 }
 0x77a   : > { %1505 = vadd.xlane.f32.xlu0 %v1504_v10  ;;  %v1736_v10 = vld [vmem:[#allocation19 + $0x98] sm:$0xff] }
 0x7af   : > { %v1515_v12 = vpop.xlane.xlu0 %1514 }
 0x7b0   : > { %2383 = vrcp.f32 %v1515_v12 }
 0x7b6   : > { %v2384_v13 = vpop.eup %2383 }
 0x7b7   : > { %v1523_v14 = vmul.f32 %v2384_v13, %v2376_v58  ;;  %v1747_v58 = vld [vmem:[#allocation19 + $0xf0] sm:$0xff]  ;;  %v1733_v13 = vld [vmem:[#allocation19 + $0x80] sm:$0xff] }
 0x7c1   : > { %v1509_v18 = vpop.xlane.xlu1 %1508 }
 0x7c2   : > { %v1382_v16 = vpop.permute.xlu0 %1381 }
 0x7c3   : > { %1611 = vmatpush.msrb.mxu2 %v1382_v16 }
 0x7c4   : > { %2181 = vmatmul.msk.f32.vlgmr.msrb.gmra.mxu2 %vm1002_vm1, %v1523_v14  ;;  %v1734_v14 = vld [vmem:[#allocation19 + $0x88] sm:$0xff] }
 0x7c5   : > { %1833 = vmatpush.msra.mxu2 %v1812_v39 }
 0x7c7   : > { %1834 = vmatpush.msra.mxu2 %v1811_v41 }
 0x7c9   : > { %v1512_v17 = vpop.xlane.xlu2 %1511  ;;  %1835 = vmatpush.msra.mxu2 %v1810_v44 }
 0x7ca   : > { %2385 = vrcp.f32 %v1512_v17  ;;  %v1731_v17 = vld [vmem:[#allocation19 + $0x70] sm:$0xff] }
 0x7cb   : > { %2387 = vrcp.f32 %v1509_v18  ;;  %v1732_v18 = vld [vmem:[#allocation19 + $0x78] sm:$0xff] }
 0x7d0   : > { %v2386_v31 = vpop.eup %2385 }
 0x7d1   : > { %v1522_v11 = vmul.f32 %v2386_v31, %v2380_v4  ;;  %v1379_v19 = vpop.permute.xlu2 %1378  ;;  %v2388_v20 = vpop.eup %2387 }
 0x7d2   : > { %1588 = vmatpush.msrb.mxu1 %v1379_v19  ;;  %v1521_v21 = vmul.f32 %v2388_v20, %v2378_v1  ;;  %v1730_v19 = vld [vmem:[#allocation19 + $0x68] sm:$0xff]  ;;  %v1727_v20 = vld [vmem:[#allocation19 + $0x50] sm:$0xff] }
 0x7d3   : > { %2180 = vmatmul.msk.f32.vlgmr.msrb.gmra.mxu1 %vm1002_vm1, %v1522_v11  ;;  %v1729_v11 = vld [vmem:[#allocation19 + $0x60] sm:$0xff] }
 0x7d4   : > { %1775 = vmatpush.msra.mxu1 %v1748_v59  ;;  %v1805_v59 = vld [vmem:[#allocation21 + $0x40] sm:$0xff] }
 0x7d6   : > { %1776 = vmatpush.msra.mxu1 %v1746_v61  ;;  %v1804_v61 = vld [vmem:[#allocation21 + $0x38] sm:$0xff] }
 0x7d8   : > { %1777 = vmatpush.msra.mxu1 %v1744_v63 }
 0x7d9   : > { %v1376_v22 = vpop.permute.xlu1 %1375 }
 0x7da   : > { %1565 = vmatpush.msrb.mxu0 %v1376_v22  ;;  %v1725_v22 = vld [vmem:[#allocation19 + $0x40] sm:$0xff] }
 0x7db   : > { %2179 = vmatmul.msk.f32.vlgmr.msrb.gmra.mxu0 %vm1002_vm1, %v1521_v21  ;;  %v1728_v21 = vld [vmem:[#allocation19 + $0x58] sm:$0xff] }
 0x7dc   : > { %1755 = vmatpush.msra.mxu0 %v1747_v58  ;;  %v1822_v58 = vld [vmem:[#allocation21 + $0xc8] sm:$0xff] }
 0x7de   : > { %1756 = vmatpush.msra.mxu0 %v1745_v60  ;;  %v1821_v60 = vld [vmem:[#allocation21 + $0xc0] sm:$0xff] }
 0x7e0   : > { %1757 = vmatpush.msra.mxu0 %v1743_v62  ;;  %v1820_v62 = vld [vmem:[#allocation21 + $0xb8] sm:$0xff] }
 0x7e2   : > { %1758 = vmatpush.msra.mxu0 %v1741_v0 }
 0x7e4   : > { %1759 = vmatpush.msra.mxu0 %v1739_v2 }
 0x7e6   : > { %1760 = vmatpush.msra.mxu0 %v1737_v5  ;;  %v1818_v5 = vld [vmem:[#allocation21 + $0xa8] sm:$0xff] }
 0x7ed   : > { %v1506_v23 = vpop.xlane.xlu0 %1505 }
 0x7ee   : > { %2389 = vrcp.f32 %v1506_v23  ;;  %v1726_v23 = vld [vmem:[#allocation19 + $0x48] sm:$0xff] }
 0x7f4   : > { %v2390_v24 = vpop.eup %2389 }
 0x7f5   : > { %v1520_v25 = vmul.f32 %v2390_v24, %v2382_v9  ;;  %v1735_v9 = vld [vmem:[#allocation19 + $0x90] sm:$0xff] }
 0x7f6   : > { %1761 = vmatpush.msra.mxu0 %v1735_v9  ;;  %v1723_v24 = vld [vmem:[#allocation19 + $0x30] sm:$0xff]  ;;  %v1801_v9 = vld [vmem:[#allocation21 + $0x20] sm:$0xff] }
 0x7f7   : > { %2178 = vmatmul.msk.f32.vlgmr.msra.gmra.mxu3 %vm1002_vm1, %v1520_v25  ;;  %v1724_v25 = vld [vmem:[#allocation19 + $0x38] sm:$0xff] }
 0x7f8   : > { %1762 = vmatpush.msra.mxu0 %v1733_v13  ;;  %1853 = vmatpush.msra.mxu3 %v1828_v40  ;;  %v1800_v13 = vld [vmem:[#allocation21 + $0x18] sm:$0xff] }
 0x7fa   : > { %1763 = vmatpush.msra.mxu0 %v1731_v17  ;;  %1854 = vmatpush.msra.mxu3 %v1827_v43  ;;  %v1711_v17 = vstv %s3291_s22  ;;  %s2758_s22 = sshra.s32 %s1936_s30, 4  ;;  %s2759_s22 = int_to_ptr.hbm [resolvable:$true] %s2758_s22 }
 0x7fb   : > { %p2765_p7 = scmp.lt.s32.totalorder %s2759_s22, %s3401_s0 }
 0x7fc   : > { %1764 = vmatpush.msra.mxu0 %v1729_v11  ;;  %1855 = vmatpush.msra.mxu3 %v1826_v30 }
 0x7fe   : > { %1765 = vmatpush.msra.mxu0 %v1727_v20  ;;  %v1715_v20 = vstv %s2183_s15  ;;  %s2760_s15 = scalar_lea.hbm %s2759_s22, 8 }
 0x7ff   : > { %p2761_p1 = scmp.ne.s32.totalorder %s2759_s22, %s2760_s15 }
 0x800   : > { %1766 = vmatpush.msra.mxu0 %v1725_v22 }
 0x801   : > { %p2762_p3 = pnand %p2761_p1, %p3078_p4 }
 0x802   : > { %1767 = vmatpush.msra.mxu0 %v1723_v24  ;;  %v1815_v24 = vld [vmem:[#allocation21 + $0x90] sm:$0xff] }
 0x803   : > { %p2763_p12 = pneg %p2762_p3 }
 0x847   : > { %v1613_v28 = vpop.f32.mrf.mxu2 }
 0x850   : > { %v1590_v26 = vpop.f32.mrf.mxu1 }
 0x851   : > { %1621 = vrot.lane.b32.xlu2 %v1590_v26, %s2857_s8  ;;  %s2184_s8 = sld [smem:[#allocation2 + $0x4]] }
 0x858   : > { %v1567_v27 = vpop.f32.mrf.mxu0 }
 0x859   : > { %1617 = vrot.lane.b32.xlu1 %v1567_v27, %s2858_s19  ;;  %s2185_s19 = sld [smem:[#allocation2 + $0x5]] }
 0x861   : > { %1625 = vrot.lane.b32.xlu1 %v1613_v28, %s2856_s17  ;;  %v1721_v28 = vld [vmem:[#allocation19 + $0x20] sm:$0xff]  ;;  %s3400_s17 = sld [smem:[#allocation47_spill]] }
 0x862   : > { %1768 = vmatpush.msra.mxu0 %v1721_v28  ;;  %v1813_v28 = vld [vmem:[#allocation21 + $0x80] sm:$0xff] }
 0x864   : > { %1769 = vmatpush.msra.mxu0 %v1719_v33 }
 0x866   : > { %1770 = vmatpush.msra.mxu0 %v1717_v36 }
 0x87a   : > { %v1544_v47 = vpop.f32.mrf.mxu3 }
 0x8ab   : > { %v1622_v49 = vpop.permute.xlu2 %1621 }
 0x8cb   : > { %v1618_v46 = vpop.permute.xlu1 %1617 }
 0x8cc   : > { %v1628_v48 = vsel %vm905_vm0, %v1544_v47, %v1618_v46  ;;  %v1809_v47 = vld [vmem:[#allocation21 + $0x60] sm:$0xff] }
 0x8cd   : > { %v1629_v51 = vsel %vm1152_vm2, %v1628_v48, %v1622_v49  ;;  %v1825_v48 = vld [vmem:[#allocation21 + $0xe0] sm:$0xff]  ;;  %1836 = vmatpush.msra.mxu2 %v1809_v47 }
 0x8ce   : > { %1856 = vmatpush.msra.mxu3 %v1825_v48 }
 0x8d3   : > { %v1626_v50 = vpop.permute.xlu1 %1625 }
 0x8d4   : > { %v1630_v52 = vsel %vm1154_vm3, %v1629_v51, %v1626_v50  ;;  %v1808_v51 = vld [vmem:[#allocation21 + $0x58] sm:$0xff] }
 0x8d5   : > { %1667 = vmatmul.f32.vlgmr.msrb.gmra.mxu3 %v1630_v52  ;;  %v1824_v52 = vld [vmem:[#allocation21 + $0xd8] sm:$0xff]  ;;  %1837 = vmatpush.msra.mxu2 %v1808_v51 }
 0x8d6   : > { %1857 = vmatpush.msra.mxu3 %v1824_v52 }
 0x958   : > { %v1668_v54 = vpop.f32.mrf.mxu3 }
 0x959   : > { %v1669_v55 = vadd.f32 %v2353_v53, %v1668_v54  ;;  %v1807_v54 = vld [vmem:[#allocation21 + $0x50] sm:$0xff] }
 0x95a   : > { %1838 = vmatpush.msra.mxu2 %v1807_v54 }
 0x95b   : > { %v3283_v56 = vadd.f32 %v1669_v55, %v3233_v15  ;;  %v1742_v15 = vld [vmem:[#allocation19 + $0xc8] sm:$0xff]  ;;  %v1823_v55 = vld [vmem:[#allocation21 + $0xd0] sm:$0xff] }
 0x95c   : > { %1778 = vmatpush.msra.mxu1 %v1742_v15  ;;  %1858 = vmatpush.msra.mxu3 %v1823_v55  ;;  %v1803_v15 = vld [vmem:[#allocation21 + $0x30] sm:$0xff] }
 0x95d   : > { %1674 = vadd.xlane.f32.xlu2 %v3283_v56  ;;  %v1676_v57 = vmul.f32 %v3283_v56, %v3283_v56 }
 0x95e   : > { %1779 = vmatpush.msra.mxu1 %v1740_v3  ;;  %1859 = vmatpush.msra.mxu3 %v1822_v58  ;;  %v1802_v3 = vld [vmem:[#allocation21 + $0x28] sm:$0xff] }
 0x95f   : > { %1677 = vadd.xlane.f32.xlu1 %v1676_v57  ;;  %v1806_v57 = vld [vmem:[#allocation21 + $0x48] sm:$0xff] }
 0x960   : > { %1780 = vmatpush.msra.mxu1 %v1738_v6  ;;  %1839 = vmatpush.msra.mxu2 %v1806_v57 }
 0x961   : > { %1860 = vmatpush.msra.mxu3 %v1821_v60 }
 0x962   : > { %1781 = vmatpush.msra.mxu1 %v1736_v10  ;;  %1840 = vmatpush.msra.mxu2 %v1805_v59  ;;  %v1817_v10 = vld [vmem:[#allocation21 + $0xa0] sm:$0xff] }
 0x963   : > { %1861 = vmatpush.msra.mxu3 %v1820_v62 }
 0x964   : > { %1782 = vmatpush.msra.mxu1 %v1734_v14  ;;  %1841 = vmatpush.msra.mxu2 %v1804_v61  ;;  %v1816_v14 = vld [vmem:[#allocation21 + $0x98] sm:$0xff] }
 0x966   : > { %1783 = vmatpush.msra.mxu1 %v1732_v18  ;;  %1842 = vmatpush.msra.mxu2 %v1803_v15 }
 0x968   : > { %1784 = vmatpush.msra.mxu1 %v1730_v19  ;;  %1843 = vmatpush.msra.mxu2 %v1802_v3 }
 0x96a   : > { %1785 = vmatpush.msra.mxu1 %v1728_v21  ;;  %1844 = vmatpush.msra.mxu2 %v1801_v9 }
 0x96c   : > { %1786 = vmatpush.msra.mxu1 %v1726_v23  ;;  %1845 = vmatpush.msra.mxu2 %v1800_v13  ;;  %v1799_v23 = vld [vmem:[#allocation21 + $0x10] sm:$0xff]  ;;  %v1917_v13 = vstv %s2185_s19 }
 0x96e   : > { %1787 = vmatpush.msra.mxu1 %v1724_v25  ;;  %1846 = vmatpush.msra.mxu2 %v1799_v23  ;;  %v1798_v25 = vld [vmem:[#allocation21 + $0x8] sm:$0xff] }
 0x970   : > { %1788 = vmatpush.msra.mxu1 %v1722_v29  ;;  %1847 = vmatpush.msra.mxu2 %v1798_v25 }
 0x972   : > { %1789 = vmatpush.msra.mxu1 %v1720_v34 }
 0x974   : > { %1790 = vmatpush.msra.mxu1 %v1718_v37 }
 0x9d0   : > { %v1675_v1 = vpop.xlane.xlu2 %1674 }
 0x9d1   : > { %v3288_v4 = vmul.f32 0.0078125, %v1675_v1 }
 0x9d2   : > { %v1678_v8 = vpop.xlane.xlu1 %1677 }
 0x9d3   : > { %v1680_v7 = vmul.f32 %v3288_v4, %v1675_v1  ;;  %v1819_v1 = vld [vmem:[#allocation21 + $0xb0] sm:$0xff]  ;;  %v1713_v11 = vsub.f32 %v3283_v56, %v3288_v4  ;;  %v1749_v56 = vld [vmem:[%s3399_s12] sm:$0x3]  ;;  %s2764_s12 = scalar_lea.hbm %s3401_s0, 16 }
 0x9d4   : > { %1862 = vmatpush.msra.mxu3 %v1819_v1  ;;  %v1751_v4 = vperm.slane %v1749_v56, 0  ;;  %v1752_v29 = vperm.slane %v1749_v56, 1  ;;  %p2766_p9 = scmp.lt.s32.totalorder %s2764_s12, %s2760_s15 }
 0x9d5   : > { %v1681_v12 = vsub.f32 %v1678_v8, %v1680_v7 }
 0x9d6   : > { %1863 = vmatpush.msra.mxu3 %v1818_v5  ;;  %p2767_p8 = por %p2766_p9, %p2765_p7 }
 0x9d7   : > { %v1682_v16 = vmax.f32 %v1681_v12, 0.0 }
 0x9d8   : > { %1864 = vmatpush.msra.mxu3 %v1817_v10  ;;  %p2768_p10 = pnand %p2767_p8, %p2763_p12 }
 0x9d9   : > { %v1683_v31 = vmul.f32 0.007874016, %v1682_v16 }
 0x9da   : > { %1865 = vmatpush.msra.mxu3 %v1816_v14 }
 0x9db   : > { %2391 = vrsqrt.f32 %v1683_v31  ;;  %vm1691_vm10 = vcmp.eq.f32.partialorder %v1683_v31, inf  ;;  %v1694_v46 = vand.u32 2147483648, %v1683_v31  ;;  %vm1693_vm11 = vcmp.eq.f32.partialorder %v1683_v31, 0.0 }
 0x9dc   : > { %1866 = vmatpush.msra.mxu3 %v1815_v24 }
 0x9e1   : > { %v2392_v26 = vpop.eup %2391 }
 0x9e2   : > { %v1685_v27 = vmul.f32 %v2392_v26, %v1683_v31 }
 0x9e4   : > { %v1686_v32 = vmul.f32 %v2392_v26, %v1685_v27  ;;  %v1797_v27 = vld [vmem:[#allocation21] sm:$0xff] }
 0x9e5   : > { %1848 = vmatpush.msra.mxu2 %v1797_v27 }
 0x9e6   : > { %v1687_v35 = vmul.f32 0.5, %v1686_v32 }
 0x9e8   : > { %v1688_v38 = vsub.f32 1.5, %v1687_v35 }
 0x9ea   : > { %v1689_v42 = vmul.f32 %v2392_v26, %v1688_v38  ;;  %v1814_v26 = vld [vmem:[#allocation21 + $0x88] sm:$0xff]  ;;  %v2354_v38 = vld [vmem:[%s3400_s17] ss:$0 sm:$0xff] }
 0x9eb   : > { %1867 = vmatpush.msra.mxu3 %v1814_v26 }
 0x9ec   : > { %v1690_v45 = vmul.f32 %v1689_v42, %v1683_v31 }
 0x9ed   : > { %1868 = vmatpush.msra.mxu3 %v1813_v28 }
 0x9ee   : > { %v1692_v49 = vsel %vm1691_vm10, %v1683_v31, %v1690_v45 }
 0x9ef   : > { %v1695_v50 = vsel %vm1693_vm11, %v1694_v46, %v1692_v49 }
 0x9f0   : > { %v1696_v53 = vadd.f32 1e-05, %v1695_v50 }
 0x9f2   : > { %2393 = vrcp.f32 %v1696_v53  ;;  %v1708_v6 = vand.u32 2147483648, %v1696_v53  ;;  %v1706_v8 = vand.u32 2147483647, %v1696_v53  ;;  %vm1702_vm13 = vweird.f32 %v1696_v53 }
 0x9f4   : > { %v1709_v16 = vor.u32 1.1754944e-38, %v1708_v6  ;;  %vm1707_vm15 = vcmp.eq.f32.partialorder %v1706_v8, 8.507059e+37 }
 0x9f8   : > { %v2394_v63 = vpop.eup %2393 }
 0x9f9   : > { %v1698_v0 = vmul.f32 %v2394_v63, %v1696_v53  ;;  %vm1703_vm12 = vweird.f32 %v2394_v63 }
 0x9fa   : > { %vm1704_vm14 = vmor %vm1702_vm13, %vm1703_vm12 }
 0x9fb   : > { %v1699_v2 = vsub.f32 1.0, %v1698_v0 }
 0x9fd   : > { %v1700_v7 = vmul.f32 %v2394_v63, %v1699_v2 }
 0x9ff   : > { %v1701_v12 = vadd.f32 %v2394_v63, %v1700_v7  ;;  %v1913_v7 = vstv %s2184_s8 }
 0xa01   : > { %v1705_v18 = vsel %vm1704_vm14, %v2394_v63, %v1701_v12 }
 0xa02   : > { %v1710_v31 = vsel %vm1707_vm15, %v1709_v16, %v1705_v18 }
 0xa03   : > { %v1712_v19 = vmul.f32 %v1711_v17, %v1710_v31 }
 0xa05   : > { %v1714_v21 = vmul.f32 %v1713_v11, %v1712_v19 }
 0xa07   : > { %v1716_v22 = vadd.f32 %v1715_v20, %v1714_v21 }
 0xa09   : > { %1771 = vmatmul.f32.vlgmr.msra.gmra.mxu0 %v1716_v22  ;;  %1791 = vmatmul.f32.vlgmr.msra.gmra.mxu1 %v1716_v22 }
 0xa86   : > { %v1772_v32 = vpop.f32.mrf.mxu0  ;;  %v1792_v33 = vpop.f32.mrf.mxu1 }
 0xa87   : > { %v1773_v34 = vadd.f32 %v1772_v32, %v1751_v4  ;;  %v1793_v35 = vadd.f32 %v1792_v33, %v1752_v29 }
 0xa89   : > { %v1795_v36 = vmax.f32 %v1773_v34, 0.0  ;;  %v1796_v37 = vmax.f32 %v1793_v35, 0.0 }
 0xa8b   : > { %1849 = vmatmul.f32.vlgmr.msra.gmra.mxu2 %v1795_v36  ;;  %1869 = vmatmul.f32.vlgmr.msra.gmra.mxu3 %v1796_v37 }
 0xb0e   : > { %v1850_v39 = vpop.f32.mrf.mxu2  ;;  %v1870_v41 = vpop.f32.mrf.mxu3 }
 0xb0f   : > { %v1851_v40 = vadd.f32 %v2354_v38, %v1850_v39 }
 0xb11   : > { %v1871_v42 = vadd.f32 %v1870_v41, %v1851_v40 }
 0xb13   : > { %v1873_v43 = vadd.f32 %v1871_v42, %v1716_v22 }
 0xb15   : > { %1876 = vadd.xlane.f32.xlu0 %v1873_v43  ;;  %v1878_v44 = vmul.f32 %v1873_v43, %v1873_v43 }
 0xb1d   : > { %1879 = vadd.xlane.f32.xlu0 %v1878_v44 }
 0xb88   : > { %v1877_v30 = vpop.xlane.xlu0 %1876 }
 0xb89   : > { %v1881_v45 = vmul.f32 0.0078125, %v1877_v30 }
 0xb8b   : > { %v1882_v46 = vmul.f32 %v1881_v45, %v1877_v30  ;;  %v1915_v10 = vsub.f32 %v1873_v43, %v1881_v45 }
 0xb90   : > { %v1880_v47 = vpop.xlane.xlu0 %1879 }
 0xb91   : > { %v1883_v48 = vsub.f32 %v1880_v47, %v1882_v46 }
 0xb93   : > { %v1884_v49 = vmax.f32 %v1883_v48, 0.0 }
 0xb95   : > { %v1885_v50 = vmul.f32 0.007874016, %v1884_v49 }
 0xb97   : > { %2395 = vrsqrt.f32 %v1885_v50  ;;  %vm1893_vm0 = vcmp.eq.f32.partialorder %v1885_v50, inf  ;;  %v1896_v59 = vand.u32 2147483648, %v1885_v50  ;;  %vm1895_vm1 = vcmp.eq.f32.partialorder %v1885_v50, 0.0 }
 0xb9d   : > { %v2396_v51 = vpop.eup %2395 }
 0xb9e   : > { %v1887_v52 = vmul.f32 %v2396_v51, %v1885_v50 }
 0xba0   : > { %v1888_v53 = vmul.f32 %v2396_v51, %v1887_v52 }
 0xba2   : > { %v1889_v54 = vmul.f32 0.5, %v1888_v53 }
 0xba4   : > { %v1890_v55 = vsub.f32 1.5, %v1889_v54 }
 0xba6   : > { %v1891_v57 = vmul.f32 %v2396_v51, %v1890_v55 }
 0xba8   : > { %v1892_v58 = vmul.f32 %v1891_v57, %v1885_v50 }
 0xbaa   : > { %v1894_v60 = vsel %vm1893_vm0, %v1885_v50, %v1892_v58 }
 0xbab   : > { %v1897_v61 = vsel %vm1895_vm1, %v1896_v59, %v1894_v60 }
 0xbac   : > { %v1898_v62 = vadd.f32 1e-05, %v1897_v61 }
 0xbae   : > { %2397 = vrcp.f32 %v1898_v62  ;;  %v1910_v1 = vand.u32 2147483648, %v1898_v62  ;;  %v1908_v3 = vand.u32 2147483647, %v1898_v62  ;;  %vm1904_vm3 = vweird.f32 %v1898_v62 }
 0xbb0   : > { %v1911_v6 = vor.u32 1.1754944e-38, %v1910_v1  ;;  %vm1909_vm5 = vcmp.eq.f32.partialorder %v1908_v3, 8.507059e+37 }
 0xbb4   : > { %v2398_v63 = vpop.eup %2397 }
 0xbb5   : > { %v1900_v0 = vmul.f32 %v2398_v63, %v1898_v62  ;;  %vm1905_vm2 = vweird.f32 %v2398_v63 }
 0xbb6   : > { %vm1906_vm4 = vmor %vm1904_vm3, %vm1905_vm2 }
 0xbb7   : > { %v1901_v15 = vsub.f32 1.0, %v1900_v0 }
 0xbb9   : > { %v1902_v2 = vmul.f32 %v2398_v63, %v1901_v15 }
 0xbbb   : > { %v1903_v5 = vadd.f32 %v2398_v63, %v1902_v2 }
 0xbbd   : > { %v1907_v8 = vsel %vm1906_vm4, %v2398_v63, %v1903_v5 }
 0xbbe   : > { %v1912_v9 = vsel %vm1909_vm5, %v1911_v6, %v1907_v8 }
 0xbbf   : > { %v1914_v12 = vmul.f32 %v1913_v7, %v1912_v9 }
 0xbc1   : > { %v1916_v14 = vmul.f32 %v1915_v10, %v1914_v12 }
 0xbc3   : > { %v1918_v16 = vadd.f32 %v1917_v13, %v1916_v14 }
 0xbc5   : > { %1919 = vst [vmem:[%s762_s29] sm:$0xff] %v1918_v16 }
 0xbc6   : > { %2771 = shalt.err (!%p2768_p10)
}
 0xbc7   : > { %2234 = dma.vmem_to_hbm [thread:$0]  (%p3078_p4), %s1934_s6, 128, %s1936_s30, %s1921_s13  }
 0xbc8 PF: > { %s1947_s9 = sand.u32 1, %s2826_s24   ;;  %p3402_p11 = scmp.ge.s32.totalorder %s2838_s27, 2 }
 0xbc9   : > { %s1948_s5 = scalar_lea.sflag [#allocation4], %s1947_s9 }
 0xbca   : > { %p2275_p5 = pnand %p3402_p11, %p3082_p6 }
 0xbcc   : > { %p2276_p13 = pneg %p2275_p5 }
 0xbce   : > { %2821 = dma.done.wait (%p2276_p13), %s1948_s5, 128  }
 0xbcf   : > { %2823 = vsyncadd (%p2276_p13), %s1948_s5, 4294967168  ;;  %s3403_s17 = sld [smem:[#allocation32_spill]]  ;;  %p38_p0 = scmp.ge.s32.totalorder %s3052_s21, 4  }
 0xbd0   : > { %s3404_s24 = smov %s2830_s25  ;;  %s3405_s25 = smov %s2834_s26 }
 0xbd1   : > { %s3407_s27 = smov %s3052_s21  ;;  %40 = sbr.rel (!%p38_p0) target bundleno = 29 (0x1d), region = 187 }
 0xbd5   : > { %s3406_s26 = smov %s3403_s17 }
 0xbd6   :  { %1954 = vsyncpa [#allocation3], 1 }
 0xbd7   :  { %1956 = vsyncpa [#allocation3 + $0x1], 1 }
 0xbd8   :  { %1957 = vsyncpa [#allocation8], 1 }
 0xbd9   :  { %1959 = vsyncpa [#allocation8 + $0x1], 1 }
 0xbda   :  { %1960 = vsyncpa [#allocation11], 1 }
 0xbdb   :  { %1961 = vsyncpa [#allocation14], 1 }
 0xbdc   :  { %1962 = vsyncpa [#allocation17], 1 }
 0xbdd   :  { %1963 = vsyncpa [#allocation20], 1 }
 0xbde   :  { %1964 = vsyncpa [#allocation4], 1 }
 0xbdf   :  { %1966 = vsyncpa [#allocation4 + $0x1], 1 }
 0xbe0   :  { %1967 = vsyncpa [#allocation5], 1 }
 0xbe1   :  { %1969 = vsyncpa [#allocation5 + $0x1], 1 }

</bundles_post_ra>
